<compile_context>
chip_gen: v5e
topology: v5e:2x2
jax: 0.10.0
libtpu: 0.0.40
codegen_flags: <defaults>
</compile_context>

<pallas_src>
import jax
import jax.numpy as jnp
from jax import lax
from jax.experimental import pallas as pl
from jax.experimental.pallas import tpu as pltpu


def _round_up(n, m):
    return ((n + m - 1) // m) * m


def make_params(key, embed_dim, hidden_dim):
    """Deterministic synthetic parameters, shaped exactly like the PyTorch module."""
    E, H = embed_dim, hidden_dim
    ks = jax.random.split(key, 16)

    def unif(k, shape, scale):
        return jax.random.uniform(k, shape, jnp.float32, -scale, scale)

    inv = lambda n: 1.0 / float(n) ** 0.5
    P = {}
    P["W_s"] = unif(ks[0], (H, 2 * H), inv(2 * H))
    P["b_s"] = unif(ks[1], (H,), inv(2 * H))
    P["W_i2x"] = unif(ks[2], (E, 2 * H + E), inv(2 * H + E))
    P["b_i2x"] = unif(ks[3], (E,), inv(2 * H + E))
    P["W_pg"] = unif(ks[4], (1, 4 * H + E), inv(4 * H + E))
    P["b_pg"] = unif(ks[5], (1,), inv(4 * H + E))
    P["W_out"] = unif(ks[6], (H, 3 * H), inv(3 * H))
    P["b_out"] = unif(ks[7], (H,), inv(3 * H))
    P["W_h"] = unif(ks[8], (H, 2 * H), inv(2 * H))       # 1x1 conv weight (out, in)
    P["b_h"] = unif(ks[9], (H,), inv(2 * H))
    P["v"] = jax.random.uniform(ks[10], (H,), jnp.float32, 0.0, 1.0)
    P["W_ih"] = unif(ks[11], (4 * H, E), inv(H))         # LSTM gates (i, f, g, o)
    P["b_ih"] = unif(ks[12], (4 * H,), inv(H))
    P["W_hh"] = unif(ks[13], (4 * H, H), inv(H))
    P["b_hh"] = unif(ks[14], (4 * H,), inv(H))
    return P


def attention_decoder_pallas(decoder_inputs, initial_state, encoder_states,
                             enc_padding_mask, P):
    T, B, E = decoder_inputs.shape
    _, A, H2 = encoder_states.shape
    H = H2 // 2
    h0, c0 = initial_state
    f32 = jnp.float32
    mask_f = enc_padding_mask.astype(f32)
    enc = encoder_states.astype(f32)

    # ---------------- wrapper-side, time-invariant precompute ------------------
    # Encoder features (1x1 conv == per-position linear) with b_h folded in;
    # b_s is also folded here (it is added together with the decoder features
    # under the tanh, so this is mathematically identical).
    enc_feat = (jnp.einsum("bad,hd->bah", enc, P["W_h"])
                + P["b_h"] + P["b_s"]).astype(f32)

    # x_t = input2x(cat([dec_t, zero-ctx])) -> only the dec half of W_i2x is live.
    Wi2x_dec = P["W_i2x"][:, :E]                                        # (E, E) out,in
    X = jnp.einsum("tbe,fe->tbf", decoder_inputs.astype(f32), Wi2x_dec) + P["b_i2x"]
    # Hoisted x-path matmuls (the serial loop only sees their results).
    GX = jnp.einsum("tbe,ge->tbg", X, P["W_ih"]) + (P["b_ih"] + P["b_hh"])  # (T,B,4H)
    wpg = P["W_pg"][0]                                                  # (4H + E,)
    PGX = (jnp.einsum("tbe,e->tb", X, wpg[4 * H:])[..., None]
           + P["b_pg"]).astype(f32)                                     # (T, B, 1)

    # ---------------- packed, lane-dense per-step weights ----------------------
    Ws_T = P["W_s"].T        # (2H, H): rows [0:H] consume h, [H:2H] consume c
    Wo_T = P["W_out"].T      # (3H, H): rows [0:H] consume cell_out(=h), [H:3H] ctx
    Wh_lstm = P["W_hh"].T    # (H, 4H): LSTM recurrent weights (gates i|f|g|o)

    NH = _round_up(6 * H + 1, 128)   # h-consumers: [gates 4H | dec_feat H | out H | pgen 1 | pad]
    NC = _round_up(H + 1, 128)       # c-consumers: [dec_feat H | pgen 1 | pad]
    NX = _round_up(H + 1, 128)       # ctx-consumers: [out H | pgen 1 | pad]

    W_hp = jnp.concatenate(
        [Wh_lstm, Ws_T[:H], Wo_T[:H], wpg[2 * H:3 * H].reshape(H, 1),
         jnp.zeros((H, NH - (6 * H + 1)), f32)], axis=1)                # (H, NH)
    W_cp = jnp.concatenate(
        [Ws_T[H:], wpg[3 * H:4 * H].reshape(H, 1),
         jnp.zeros((H, NC - (H + 1)), f32)], axis=1)                    # (H, NC)
    W_xp = jnp.concatenate(
        [Wo_T[H:], wpg[0:2 * H].reshape(2 * H, 1),
         jnp.zeros((2 * H, NX - (H + 1)), f32)], axis=1)                # (2H, NX)

    v_row = P["v"].reshape(1, H).astype(f32)
    b_out_row = P["b_out"].reshape(1, H).astype(f32)

    OUTW = _round_up(H + A + 1, 128)  # packed per-step output lanes: [out | attn | pgen | 0]

    # ---------------- kernel ----------------------------------------------------
    def kernel(gx_ref, pgx_ref, h0_ref, c0_ref, enc_ref, encfeat_ref, mask_ref,
               whp_ref, wcp_ref, wxp_ref, v_ref, bout_ref,
               slab_ref, hfin_ref, cfin_ref):
        enc_v = enc_ref[...]                      # (B, A, 2H)
        encf = encfeat_ref[...]                   # (B, A, H)   (b_h + b_s folded)
        mask = mask_ref[...]                      # (B, A)
        Whp = whp_ref[...]                        # (H, NH)
        Wcp = wcp_ref[...]                        # (H, NC)
        Wxp = wxp_ref[...]                        # (2H, NX)
        v = v_ref[...]                            # (1, H)
        b_out = bout_ref[...]                     # (1, H)
        pad = jnp.zeros((B, OUTW - (H + A + 1)), jnp.float32)

        def mm(a, w):
            return jnp.dot(a, w, preferred_element_type=jnp.float32)

        # Gate contribution of the initial hidden state (one packed matmul).
        gh0 = mm(h0_ref[...], Whp)[:, 0:4 * H]

        def step(t, carry):
            h_prev, c_prev, gh_prev = carry

            # ----- LSTM cell (x-path hoisted to the wrapper, h-path carried) -----
            gates = gx_ref[t] + gh_prev                        # (B, 4H)
            sg = jax.nn.sigmoid(gates)                         # one lane-dense EUP pass
            gi = sg[:, 0:H]
            gf = sg[:, H:2 * H]
            go = sg[:, 3 * H:4 * H]
            gg = jnp.tanh(gates[:, 2 * H:3 * H])
            c_new = gf * c_prev + gi * gg
            h_new = go * jnp.tanh(c_new)

            # fused "h-consumers" / "c-consumers" matmuls (lane-dense N)
            hf = mm(h_new, Whp)                                # (B, NH)
            cf = mm(c_new, Wcp)                                # (B, NC)

            # ----- attention -----
            dec_feat = hf[:, 4 * H:5 * H] + cf[:, 0:H]         # (B, H)
            feat = jnp.tanh(encf + dec_feat[:, None, :])       # (B, A, H)
            e = jnp.sum(v[None] * feat, axis=-1)               # (B, A)
            # masked softmax folded into a single normalization (identical to
            # softmax -> mask -> renormalize: the softmax denominator cancels).
            p = jnp.exp(e - jnp.max(e, axis=1, keepdims=True)) * mask
            attn = p / jnp.sum(p, axis=1, keepdims=True)       # (B, A)
            ctx = jnp.sum(attn[:, :, None] * enc_v, axis=1)    # (B, 2H)

            # fused "ctx-consumers" matmul
            xf = mm(ctx, Wxp)                                  # (B, NX)

            out = hf[:, 5 * H:6 * H] + xf[:, 0:H] + b_out      # (B, H)
            p_gen = jax.nn.sigmoid(hf[:, 6 * H:6 * H + 1] + cf[:, H:H + 1]
                                   + xf[:, H:H + 1] + pgx_ref[t])   # (B, 1)

            # single lane-dense store per step: [out | attn | p_gen | zero-pad]
            slab_ref[t] = jnp.concatenate([out, attn, p_gen, pad], axis=-1)

            # hf[:, :4H] is the NEXT step's LSTM gate contribution of h_new.
            return (h_new, c_new, hf[:, 0:4 * H])

        h_fin, c_fin, _ = lax.fori_loop(
            0, T, step, (h0_ref[...], c0_ref[...], gh0),
            unroll=True if T <= 8 else 4)
        hfin_ref[...] = h_fin
        cfin_ref[...] = c_fin

    inputs = [GX.astype(f32), PGX, h0.astype(f32), c0.astype(f32), enc, enc_feat,
              mask_f, W_hp, W_cp, W_xp, v_row, b_out_row]

    def full_spec(arr):
        nd = arr.ndim
        return pl.BlockSpec(arr.shape, lambda i, _nd=nd: (0,) * _nd)

    in_specs = [full_spec(a) for a in inputs]

    out_shapes = (
        jax.ShapeDtypeStruct((T, B, OUTW), f32),   # packed [out | attn | p_gen]
        jax.ShapeDtypeStruct((B, H), f32),         # final h
        jax.ShapeDtypeStruct((B, H), f32),         # final c
    )
    out_specs = (
        pl.BlockSpec((T, B, OUTW), lambda i: (0, 0, 0)),
        pl.BlockSpec((B, H), lambda i: (0, 0)),
        pl.BlockSpec((B, H), lambda i: (0, 0)),
    )

    slab, h_fin, c_fin = pl.pallas_call(
        kernel,
        out_shape=out_shapes,
        grid_spec=pl.GridSpec(grid=(1,), in_specs=in_specs, out_specs=out_specs),
        compiler_params=pltpu.CompilerParams(dimension_semantics=("arbitrary",)),
    )(*inputs)

    outputs = slab[..., 0:H]
    attn_dists = slab[..., H:H + A]
    p_gens = slab[..., H + A:H + A + 1]
    # coverage is None with the default forward flags (use_coverage=False)
    return outputs, (h_fin, c_fin), attn_dists, p_gens


def attention_decoder_reference(decoder_inputs, initial_state, encoder_states,
                                enc_padding_mask, P):
    """Plain-JAX mirror of the PyTorch forward (default flags) for validation."""
    T, B, E = decoder_inputs.shape
    _, A, H2 = encoder_states.shape
    H = H2 // 2
    h, c = initial_state
    mask = enc_padding_mask.astype(jnp.float32)
    enc_feat = jnp.einsum("bad,hd->bah", encoder_states, P["W_h"]) + P["b_h"]
    outs, attns, pgens = [], [], []
    for t in range(T):
        ctx0 = jnp.zeros((B, 2 * H), jnp.float32)
        x = jnp.concatenate([decoder_inputs[t], ctx0], 1) @ P["W_i2x"].T + P["b_i2x"]
        gates = x @ P["W_ih"].T + P["b_ih"] + h @ P["W_hh"].T + P["b_hh"]
        gi, gf, gg, go = jnp.split(gates, 4, axis=1)
        c = jax.nn.sigmoid(gf) * c + jax.nn.sigmoid(gi) * jnp.tanh(gg)
        h = jax.nn.sigmoid(go) * jnp.tanh(c)
        cell_out = h
        dec_f = jnp.concatenate([h, c], 1) @ P["W_s"].T + P["b_s"]
        e = jnp.sum(P["v"] * jnp.tanh(enc_feat + dec_f[:, None, :]), axis=-1)
        attn = jax.nn.softmax(e, axis=1) * mask
        attn = attn / jnp.sum(attn, axis=1, keepdims=True)
        ctx = jnp.sum(attn[:, :, None] * encoder_states, axis=1)
        p_gen = jax.nn.sigmoid(jnp.concatenate([ctx, h, c, x], 1) @ P["W_pg"].T + P["b_pg"])
        out = jnp.concatenate([cell_out, ctx], 1) @ P["W_out"].T + P["b_out"]
        outs.append(out); attns.append(attn); pgens.append(p_gen)
    return jnp.stack(outs), (h, c), jnp.stack(attns), jnp.stack(pgens)


if __name__ == "__main__":
    B, E, H, A, T = 2, 32, 32, 8, 4
    key = jax.random.PRNGKey(0)
    kp, kd, kh, kc, ke = jax.random.split(key, 5)
    P = make_params(kp, E, H)

    decoder_inputs = jax.random.normal(kd, (T, B, E), jnp.float32)
    h0 = jax.random.normal(kh, (B, H), jnp.float32)
    c0 = jax.random.normal(kc, (B, H), jnp.float32)
    encoder_states = jax.random.normal(ke, (B, A, 2 * H), jnp.float32)
    lengths = jnp.array([A, A - 3], dtype=jnp.int32)
    enc_padding_mask = (jnp.arange(A)[None, :] < lengths[:, None]).astype(jnp.float32)

    outs, (hf, cf), attns, pgens = attention_decoder_pallas(
        decoder_inputs, (h0, c0), encoder_states, enc_padding_mask, P)
    jax.block_until_ready((outs, hf, cf, attns, pgens))

    r_outs, (rh, rc), r_attns, r_pgens = attention_decoder_reference(
        decoder_inputs, (h0, c0), encoder_states, enc_padding_mask, P)
    for got, ref in ((outs, r_outs), (hf, rh), (cf, rc), (attns, r_attns), (pgens, r_pgens)):
        assert got.shape == ref.shape
        assert jnp.allclose(got, ref, rtol=2e-3, atol=2e-3), float(jnp.max(jnp.abs(got - ref)))

    print("KERNEL_OK")
</pallas_src>

<mosaic_0001>
module attributes {stable_mosaic.version = 11 : i64} {
  func.func @kernel(%arg0: i32, %arg1: memref<4x2x128xf32, #tpu.memory_space<vmem>>, %arg2: memref<4x2x1xf32, #tpu.memory_space<vmem>>, %arg3: memref<2x32xf32, #tpu.memory_space<vmem>>, %arg4: memref<2x32xf32, #tpu.memory_space<vmem>>, %arg5: memref<2x8x64xf32, #tpu.memory_space<vmem>>, %arg6: memref<2x8x32xf32, #tpu.memory_space<vmem>>, %arg7: memref<2x8xf32, #tpu.memory_space<vmem>>, %arg8: memref<32x256xf32, #tpu.memory_space<vmem>>, %arg9: memref<32x128xf32, #tpu.memory_space<vmem>>, %arg10: memref<64x128xf32, #tpu.memory_space<vmem>>, %arg11: memref<1x32xf32, #tpu.memory_space<vmem>>, %arg12: memref<1x32xf32, #tpu.memory_space<vmem>>, %arg13: memref<4x2x128xf32, #tpu.memory_space<vmem>>, %arg14: memref<2x32xf32, #tpu.memory_space<vmem>>, %arg15: memref<2x32xf32, #tpu.memory_space<vmem>>) attributes {dimension_semantics = [#tpu.dimension_semantics<arbitrary>], iteration_bounds = array<i64: 1>, scalar_prefetch = 0 : i64, scratch_operands = 0 : i64, tpu.core_type = #tpu.core_type<tc>, window_params = [{pipeline_mode = #tpu.pipeline_mode<synchronous>, transform_indices = @transform_0, window_bounds = array<i64: 4, 2, 128>}, {pipeline_mode = #tpu.pipeline_mode<synchronous>, transform_indices = @transform_1, window_bounds = array<i64: 4, 2, 1>}, {pipeline_mode = #tpu.pipeline_mode<synchronous>, transform_indices = @transform_2, window_bounds = array<i64: 2, 32>}, {pipeline_mode = #tpu.pipeline_mode<synchronous>, transform_indices = @transform_3, window_bounds = array<i64: 2, 32>}, {pipeline_mode = #tpu.pipeline_mode<synchronous>, transform_indices = @transform_4, window_bounds = array<i64: 2, 8, 64>}, {pipeline_mode = #tpu.pipeline_mode<synchronous>, transform_indices = @transform_5, window_bounds = array<i64: 2, 8, 32>}, {pipeline_mode = #tpu.pipeline_mode<synchronous>, transform_indices = @transform_6, window_bounds = array<i64: 2, 8>}, {pipeline_mode = #tpu.pipeline_mode<synchronous>, transform_indices = @transform_7, window_bounds = array<i64: 32, 256>}, {pipeline_mode = #tpu.pipeline_mode<synchronous>, transform_indices = @transform_8, window_bounds = array<i64: 32, 128>}, {pipeline_mode = #tpu.pipeline_mode<synchronous>, transform_indices = @transform_9, window_bounds = array<i64: 64, 128>}, {pipeline_mode = #tpu.pipeline_mode<synchronous>, transform_indices = @transform_10, window_bounds = array<i64: 1, 32>}, {pipeline_mode = #tpu.pipeline_mode<synchronous>, transform_indices = @transform_11, window_bounds = array<i64: 1, 32>}, {pipeline_mode = #tpu.pipeline_mode<synchronous>, transform_indices = @transform_12, window_bounds = array<i64: 4, 2, 128>}, {pipeline_mode = #tpu.pipeline_mode<synchronous>, transform_indices = @transform_13, window_bounds = array<i64: 2, 32>}, {pipeline_mode = #tpu.pipeline_mode<synchronous>, transform_indices = @transform_14, window_bounds = array<i64: 2, 32>}]} {
    %c0 = arith.constant 0 : index
    %c0_0 = arith.constant 0 : index
    %c0_1 = arith.constant 0 : index
    %0 = vector.load %arg5[%c0, %c0_0, %c0_1] : memref<2x8x64xf32, #tpu.memory_space<vmem>>, vector<2x8x64xf32>
    %c0_2 = arith.constant 0 : index
    %c0_3 = arith.constant 0 : index
    %c0_4 = arith.constant 0 : index
    %1 = vector.load %arg6[%c0_2, %c0_3, %c0_4] : memref<2x8x32xf32, #tpu.memory_space<vmem>>, vector<2x8x32xf32>
    %c0_5 = arith.constant 0 : index
    %c0_6 = arith.constant 0 : index
    %2 = vector.load %arg7[%c0_5, %c0_6] : memref<2x8xf32, #tpu.memory_space<vmem>>, vector<2x8xf32>
    %c0_7 = arith.constant 0 : index
    %c0_8 = arith.constant 0 : index
    %3 = vector.load %arg8[%c0_7, %c0_8] : memref<32x256xf32, #tpu.memory_space<vmem>>, vector<32x256xf32>
    %c0_9 = arith.constant 0 : index
    %c0_10 = arith.constant 0 : index
    %4 = vector.load %arg9[%c0_9, %c0_10] : memref<32x128xf32, #tpu.memory_space<vmem>>, vector<32x128xf32>
    %c0_11 = arith.constant 0 : index
    %c0_12 = arith.constant 0 : index
    %5 = vector.load %arg10[%c0_11, %c0_12] : memref<64x128xf32, #tpu.memory_space<vmem>>, vector<64x128xf32>
    %c0_13 = arith.constant 0 : index
    %c0_14 = arith.constant 0 : index
    %6 = vector.load %arg11[%c0_13, %c0_14] : memref<1x32xf32, #tpu.memory_space<vmem>>, vector<1x32xf32>
    %c0_15 = arith.constant 0 : index
    %c0_16 = arith.constant 0 : index
    %7 = vector.load %arg12[%c0_15, %c0_16] : memref<1x32xf32, #tpu.memory_space<vmem>>, vector<1x32xf32>
    %cst = arith.constant 0.000000e+00 : f32
    %8 = vector.broadcast %cst : f32 to vector<2x87xf32>
    %c0_17 = arith.constant 0 : index
    %c0_18 = arith.constant 0 : index
    %9 = vector.load %arg3[%c0_17, %c0_18] : memref<2x32xf32, #tpu.memory_space<vmem>>, vector<2x32xf32>
    %cst_19 = arith.constant dense<0.000000e+00> : vector<2x256xf32>
    %10 = tpu.matmul %9, %3, %cst_19 {dimension_numbers = #tpu.dot_dimension_numbers<[1], [0], [0], [1], [0, 0, 1, 1], [], []>} : vector<2x32xf32>, vector<32x256xf32>, vector<2x256xf32> -> vector<2x256xf32>
    %11 = vector.extract_strided_slice %10 {offsets = [0, 0], sizes = [2, 128], strides = [1, 1]} : vector<2x256xf32> to vector<2x128xf32>
    %c0_20 = arith.constant 0 : index
    %c0_21 = arith.constant 0 : index
    %12 = vector.load %arg3[%c0_20, %c0_21] : memref<2x32xf32, #tpu.memory_space<vmem>>, vector<2x32xf32>
    %c0_22 = arith.constant 0 : index
    %c0_23 = arith.constant 0 : index
    %13 = vector.load %arg4[%c0_22, %c0_23] : memref<2x32xf32, #tpu.memory_space<vmem>>, vector<2x32xf32>
    %c0_i32 = arith.constant 0 : i32
    %14 = arith.index_cast %c0_i32 : i32 to index
    %c0_24 = arith.constant 0 : index
    %c0_25 = arith.constant 0 : index
    %15 = vector.load %arg1[%14, %c0_24, %c0_25] : memref<4x2x128xf32, #tpu.memory_space<vmem>>, vector<1x2x128xf32>
    %16 = vector.shape_cast %15 : vector<1x2x128xf32> to vector<2x128xf32>
    %17 = arith.addf %16, %11 : vector<2x128xf32>
    %18 = arith.negf %17 : vector<2x128xf32>
    %19 = math.exp %18 : vector<2x128xf32>
    %cst_26 = arith.constant 1.000000e+00 : f32
    %20 = vector.broadcast %cst_26 : f32 to vector<2x128xf32>
    %21 = arith.addf %20, %19 : vector<2x128xf32>
    %22 = arith.divf %20, %21 : vector<2x128xf32>
    %23 = vector.extract_strided_slice %22 {offsets = [0, 0], sizes = [2, 32], strides = [1, 1]} : vector<2x128xf32> to vector<2x32xf32>
    %24 = vector.extract_strided_slice %22 {offsets = [0, 32], sizes = [2, 32], strides = [1, 1]} : vector<2x128xf32> to vector<2x32xf32>
    %25 = vector.extract_strided_slice %22 {offsets = [0, 96], sizes = [2, 32], strides = [1, 1]} : vector<2x128xf32> to vector<2x32xf32>
    %26 = vector.extract_strided_slice %17 {offsets = [0, 64], sizes = [2, 32], strides = [1, 1]} : vector<2x128xf32> to vector<2x32xf32>
    %27 = math.tanh %26 : vector<2x32xf32>
    %28 = arith.mulf %24, %13 : vector<2x32xf32>
    %29 = arith.mulf %23, %27 : vector<2x32xf32>
    %30 = arith.addf %28, %29 : vector<2x32xf32>
    %31 = math.tanh %30 : vector<2x32xf32>
    %32 = arith.mulf %25, %31 : vector<2x32xf32>
    %cst_27 = arith.constant dense<0.000000e+00> : vector<2x256xf32>
    %33 = tpu.matmul %32, %3, %cst_27 {dimension_numbers = #tpu.dot_dimension_numbers<[1], [0], [0], [1], [0, 0, 1, 1], [], []>} : vector<2x32xf32>, vector<32x256xf32>, vector<2x256xf32> -> vector<2x256xf32>
    %cst_28 = arith.constant dense<0.000000e+00> : vector<2x128xf32>
    %34 = tpu.matmul %30, %4, %cst_28 {dimension_numbers = #tpu.dot_dimension_numbers<[1], [0], [0], [1], [0, 0, 1, 1], [], []>} : vector<2x32xf32>, vector<32x128xf32>, vector<2x128xf32> -> vector<2x128xf32>
    %35 = vector.extract_strided_slice %33 {offsets = [0, 128], sizes = [2, 32], strides = [1, 1]} : vector<2x256xf32> to vector<2x32xf32>
    %36 = vector.extract_strided_slice %34 {offsets = [0, 0], sizes = [2, 32], strides = [1, 1]} : vector<2x128xf32> to vector<2x32xf32>
    %37 = arith.addf %35, %36 : vector<2x32xf32>
    %38 = vector.shape_cast %37 : vector<2x32xf32> to vector<2x1x32xf32>
    %39 = vector.broadcast %38 : vector<2x1x32xf32> to vector<2x8x32xf32>
    %40 = arith.addf %1, %39 : vector<2x8x32xf32>
    %41 = math.tanh %40 : vector<2x8x32xf32>
    %42 = vector.shape_cast %6 : vector<1x32xf32> to vector<1x1x32xf32>
    %43 = vector.broadcast %42 : vector<1x1x32xf32> to vector<2x8x32xf32>
    %44 = arith.mulf %43, %41 : vector<2x8x32xf32>
    %cst_29 = arith.constant dense<0.000000e+00> : vector<2x8xf32>
    %45 = vector.multi_reduction <add>, %44, %cst_29 [2] : vector<2x8x32xf32> to vector<2x8xf32>
    %cst_30 = arith.constant dense<0xFF800000> : vector<2xf32>
    %46 = vector.multi_reduction <maximumf>, %45, %cst_30 [1] : vector<2x8xf32> to vector<2xf32>
    %47 = vector.shape_cast %46 : vector<2xf32> to vector<2x1xf32>
    %48 = vector.broadcast %47 : vector<2x1xf32> to vector<2x8xf32>
    %49 = arith.subf %45, %48 : vector<2x8xf32>
    %50 = math.exp %49 : vector<2x8xf32>
    %51 = arith.mulf %50, %2 : vector<2x8xf32>
    %cst_31 = arith.constant dense<0.000000e+00> : vector<2xf32>
    %52 = vector.multi_reduction <add>, %51, %cst_31 [1] : vector<2x8xf32> to vector<2xf32>
    %53 = vector.shape_cast %52 : vector<2xf32> to vector<2x1xf32>
    %54 = vector.broadcast %53 : vector<2x1xf32> to vector<2x8xf32>
    %55 = arith.divf %51, %54 : vector<2x8xf32>
    %56 = vector.shape_cast %55 : vector<2x8xf32> to vector<2x8x1xf32>
    %57 = vector.broadcast %56 : vector<2x8x1xf32> to vector<2x8x64xf32>
    %58 = arith.mulf %57, %0 : vector<2x8x64xf32>
    %cst_32 = arith.constant dense<0.000000e+00> : vector<2x64xf32>
    %59 = vector.multi_reduction <add>, %58, %cst_32 [1] : vector<2x8x64xf32> to vector<2x64xf32>
    %cst_33 = arith.constant dense<0.000000e+00> : vector<2x128xf32>
    %60 = tpu.matmul %59, %5, %cst_33 {dimension_numbers = #tpu.dot_dimension_numbers<[1], [0], [0], [1], [0, 0, 1, 1], [], []>} : vector<2x64xf32>, vector<64x128xf32>, vector<2x128xf32> -> vector<2x128xf32>
    %61 = vector.extract_strided_slice %33 {offsets = [0, 160], sizes = [2, 32], strides = [1, 1]} : vector<2x256xf32> to vector<2x32xf32>
    %62 = vector.extract_strided_slice %60 {offsets = [0, 0], sizes = [2, 32], strides = [1, 1]} : vector<2x128xf32> to vector<2x32xf32>
    %63 = arith.addf %61, %62 : vector<2x32xf32>
    %64 = vector.broadcast %7 : vector<1x32xf32> to vector<2x32xf32>
    %65 = arith.addf %63, %64 : vector<2x32xf32>
    %66 = vector.extract_strided_slice %33 {offsets = [0, 192], sizes = [2, 1], strides = [1, 1]} : vector<2x256xf32> to vector<2x1xf32>
    %67 = vector.extract_strided_slice %34 {offsets = [0, 32], sizes = [2, 1], strides = [1, 1]} : vector<2x128xf32> to vector<2x1xf32>
    %68 = arith.addf %66, %67 : vector<2x1xf32>
    %69 = vector.extract_strided_slice %60 {offsets = [0, 32], sizes = [2, 1], strides = [1, 1]} : vector<2x128xf32> to vector<2x1xf32>
    %70 = arith.addf %68, %69 : vector<2x1xf32>
    %71 = arith.index_cast %c0_i32 : i32 to index
    %c0_34 = arith.constant 0 : index
    %c0_35 = arith.constant 0 : index
    %72 = vector.load %arg2[%71, %c0_34, %c0_35] : memref<4x2x1xf32, #tpu.memory_space<vmem>>, vector<1x2x1xf32>
    %73 = vector.shape_cast %72 : vector<1x2x1xf32> to vector<2x1xf32>
    %74 = arith.addf %70, %73 : vector<2x1xf32>
    %75 = arith.negf %74 : vector<2x1xf32>
    %76 = math.exp %75 : vector<2x1xf32>
    %cst_36 = arith.constant 1.000000e+00 : f32
    %77 = vector.broadcast %cst_36 : f32 to vector<2x1xf32>
    %78 = arith.addf %77, %76 : vector<2x1xf32>
    %79 = arith.divf %77, %78 : vector<2x1xf32>
    %80 = tpu.concatenate %65, %55, %79, %8 in 1 : vector<2x32xf32>, vector<2x8xf32>, vector<2x1xf32>, vector<2x87xf32> -> vector<2x128xf32>
    %81 = arith.index_cast %c0_i32 : i32 to index
    %c0_37 = arith.constant 0 : index
    %c0_38 = arith.constant 0 : index
    %82 = vector.load %arg13[%81, %c0_37, %c0_38] : memref<4x2x128xf32, #tpu.memory_space<vmem>>, vector<1x2x128xf32>
    %83 = vector.shape_cast %82 : vector<1x2x128xf32> to vector<2x128xf32>
    %84 = vector.shape_cast %80 : vector<2x128xf32> to vector<1x2x128xf32>
    tpu.vector_store %arg13[%81, %c0_37, %c0_38], %84 {strides = array<i32>} : memref<4x2x128xf32, #tpu.memory_space<vmem>>, vector<1x2x128xf32>,
    %85 = vector.extract_strided_slice %33 {offsets = [0, 0], sizes = [2, 128], strides = [1, 1]} : vector<2x256xf32> to vector<2x128xf32>
    %c1_i32 = arith.constant 1 : i32
    %86 = arith.index_cast %c1_i32 : i32 to index
    %c0_39 = arith.constant 0 : index
    %c0_40 = arith.constant 0 : index
    %87 = vector.load %arg1[%86, %c0_39, %c0_40] : memref<4x2x128xf32, #tpu.memory_space<vmem>>, vector<1x2x128xf32>
    %88 = vector.shape_cast %87 : vector<1x2x128xf32> to vector<2x128xf32>
    %89 = arith.addf %88, %85 : vector<2x128xf32>
    %90 = arith.negf %89 : vector<2x128xf32>
    %91 = math.exp %90 : vector<2x128xf32>
    %cst_41 = arith.constant 1.000000e+00 : f32
    %92 = vector.broadcast %cst_41 : f32 to vector<2x128xf32>
    %93 = arith.addf %92, %91 : vector<2x128xf32>
    %94 = arith.divf %92, %93 : vector<2x128xf32>
    %95 = vector.extract_strided_slice %94 {offsets = [0, 0], sizes = [2, 32], strides = [1, 1]} : vector<2x128xf32> to vector<2x32xf32>
    %96 = vector.extract_strided_slice %94 {offsets = [0, 32], sizes = [2, 32], strides = [1, 1]} : vector<2x128xf32> to vector<2x32xf32>
    %97 = vector.extract_strided_slice %94 {offsets = [0, 96], sizes = [2, 32], strides = [1, 1]} : vector<2x128xf32> to vector<2x32xf32>
    %98 = vector.extract_strided_slice %89 {offsets = [0, 64], sizes = [2, 32], strides = [1, 1]} : vector<2x128xf32> to vector<2x32xf32>
    %99 = math.tanh %98 : vector<2x32xf32>
    %100 = arith.mulf %96, %30 : vector<2x32xf32>
    %101 = arith.mulf %95, %99 : vector<2x32xf32>
    %102 = arith.addf %100, %101 : vector<2x32xf32>
    %103 = math.tanh %102 : vector<2x32xf32>
    %104 = arith.mulf %97, %103 : vector<2x32xf32>
    %cst_42 = arith.constant dense<0.000000e+00> : vector<2x256xf32>
    %105 = tpu.matmul %104, %3, %cst_42 {dimension_numbers = #tpu.dot_dimension_numbers<[1], [0], [0], [1], [0, 0, 1, 1], [], []>} : vector<2x32xf32>, vector<32x256xf32>, vector<2x256xf32> -> vector<2x256xf32>
    %cst_43 = arith.constant dense<0.000000e+00> : vector<2x128xf32>
    %106 = tpu.matmul %102, %4, %cst_43 {dimension_numbers = #tpu.dot_dimension_numbers<[1], [0], [0], [1], [0, 0, 1, 1], [], []>} : vector<2x32xf32>, vector<32x128xf32>, vector<2x128xf32> -> vector<2x128xf32>
    %107 = vector.extract_strided_slice %105 {offsets = [0, 128], sizes = [2, 32], strides = [1, 1]} : vector<2x256xf32> to vector<2x32xf32>
    %108 = vector.extract_strided_slice %106 {offsets = [0, 0], sizes = [2, 32], strides = [1, 1]} : vector<2x128xf32> to vector<2x32xf32>
    %109 = arith.addf %107, %108 : vector<2x32xf32>
    %110 = vector.shape_cast %109 : vector<2x32xf32> to vector<2x1x32xf32>
    %111 = vector.broadcast %110 : vector<2x1x32xf32> to vector<2x8x32xf32>
    %112 = arith.addf %1, %111 : vector<2x8x32xf32>
    %113 = math.tanh %112 : vector<2x8x32xf32>
    %114 = vector.shape_cast %6 : vector<1x32xf32> to vector<1x1x32xf32>
    %115 = vector.broadcast %114 : vector<1x1x32xf32> to vector<2x8x32xf32>
    %116 = arith.mulf %115, %113 : vector<2x8x32xf32>
    %cst_44 = arith.constant dense<0.000000e+00> : vector<2x8xf32>
    %117 = vector.multi_reduction <add>, %116, %cst_44 [2] : vector<2x8x32xf32> to vector<2x8xf32>
    %cst_45 = arith.constant dense<0xFF800000> : vector<2xf32>
    %118 = vector.multi_reduction <maximumf>, %117, %cst_45 [1] : vector<2x8xf32> to vector<2xf32>
    %119 = vector.shape_cast %118 : vector<2xf32> to vector<2x1xf32>
    %120 = vector.broadcast %119 : vector<2x1xf32> to vector<2x8xf32>
    %121 = arith.subf %117, %120 : vector<2x8xf32>
    %122 = math.exp %121 : vector<2x8xf32>
    %123 = arith.mulf %122, %2 : vector<2x8xf32>
    %cst_46 = arith.constant dense<0.000000e+00> : vector<2xf32>
    %124 = vector.multi_reduction <add>, %123, %cst_46 [1] : vector<2x8xf32> to vector<2xf32>
    %125 = vector.shape_cast %124 : vector<2xf32> to vector<2x1xf32>
    %126 = vector.broadcast %125 : vector<2x1xf32> to vector<2x8xf32>
    %127 = arith.divf %123, %126 : vector<2x8xf32>
    %128 = vector.shape_cast %127 : vector<2x8xf32> to vector<2x8x1xf32>
    %129 = vector.broadcast %128 : vector<2x8x1xf32> to vector<2x8x64xf32>
    %130 = arith.mulf %129, %0 : vector<2x8x64xf32>
    %cst_47 = arith.constant dense<0.000000e+00> : vector<2x64xf32>
    %131 = vector.multi_reduction <add>, %130, %cst_47 [1] : vector<2x8x64xf32> to vector<2x64xf32>
    %cst_48 = arith.constant dense<0.000000e+00> : vector<2x128xf32>
    %132 = tpu.matmul %131, %5, %cst_48 {dimension_numbers = #tpu.dot_dimension_numbers<[1], [0], [0], [1], [0, 0, 1, 1], [], []>} : vector<2x64xf32>, vector<64x128xf32>, vector<2x128xf32> -> vector<2x128xf32>
    %133 = vector.extract_strided_slice %105 {offsets = [0, 160], sizes = [2, 32], strides = [1, 1]} : vector<2x256xf32> to vector<2x32xf32>
    %134 = vector.extract_strided_slice %132 {offsets = [0, 0], sizes = [2, 32], strides = [1, 1]} : vector<2x128xf32> to vector<2x32xf32>
    %135 = arith.addf %133, %134 : vector<2x32xf32>
    %136 = vector.broadcast %7 : vector<1x32xf32> to vector<2x32xf32>
    %137 = arith.addf %135, %136 : vector<2x32xf32>
    %138 = vector.extract_strided_slice %105 {offsets = [0, 192], sizes = [2, 1], strides = [1, 1]} : vector<2x256xf32> to vector<2x1xf32>
    %139 = vector.extract_strided_slice %106 {offsets = [0, 32], sizes = [2, 1], strides = [1, 1]} : vector<2x128xf32> to vector<2x1xf32>
    %140 = arith.addf %138, %139 : vector<2x1xf32>
    %141 = vector.extract_strided_slice %132 {offsets = [0, 32], sizes = [2, 1], strides = [1, 1]} : vector<2x128xf32> to vector<2x1xf32>
    %142 = arith.addf %140, %141 : vector<2x1xf32>
    %143 = arith.index_cast %c1_i32 : i32 to index
    %c0_49 = arith.constant 0 : index
    %c0_50 = arith.constant 0 : index
    %144 = vector.load %arg2[%143, %c0_49, %c0_50] : memref<4x2x1xf32, #tpu.memory_space<vmem>>, vector<1x2x1xf32>
    %145 = vector.shape_cast %144 : vector<1x2x1xf32> to vector<2x1xf32>
    %146 = arith.addf %142, %145 : vector<2x1xf32>
    %147 = arith.negf %146 : vector<2x1xf32>
    %148 = math.exp %147 : vector<2x1xf32>
    %cst_51 = arith.constant 1.000000e+00 : f32
    %149 = vector.broadcast %cst_51 : f32 to vector<2x1xf32>
    %150 = arith.addf %149, %148 : vector<2x1xf32>
    %151 = arith.divf %149, %150 : vector<2x1xf32>
    %152 = tpu.concatenate %137, %127, %151, %8 in 1 : vector<2x32xf32>, vector<2x8xf32>, vector<2x1xf32>, vector<2x87xf32> -> vector<2x128xf32>
    %153 = arith.index_cast %c1_i32 : i32 to index
    %c0_52 = arith.constant 0 : index
    %c0_53 = arith.constant 0 : index
    %154 = vector.load %arg13[%153, %c0_52, %c0_53] : memref<4x2x128xf32, #tpu.memory_space<vmem>>, vector<1x2x128xf32>
    %155 = vector.shape_cast %154 : vector<1x2x128xf32> to vector<2x128xf32>
    %156 = vector.shape_cast %152 : vector<2x128xf32> to vector<1x2x128xf32>
    tpu.vector_store %arg13[%153, %c0_52, %c0_53], %156 {strides = array<i32>} : memref<4x2x128xf32, #tpu.memory_space<vmem>>, vector<1x2x128xf32>,
    %157 = vector.extract_strided_slice %105 {offsets = [0, 0], sizes = [2, 128], strides = [1, 1]} : vector<2x256xf32> to vector<2x128xf32>
    %c2_i32 = arith.constant 2 : i32
    %158 = arith.index_cast %c2_i32 : i32 to index
    %c0_54 = arith.constant 0 : index
    %c0_55 = arith.constant 0 : index
    %159 = vector.load %arg1[%158, %c0_54, %c0_55] : memref<4x2x128xf32, #tpu.memory_space<vmem>>, vector<1x2x128xf32>
    %160 = vector.shape_cast %159 : vector<1x2x128xf32> to vector<2x128xf32>
    %161 = arith.addf %160, %157 : vector<2x128xf32>
    %162 = arith.negf %161 : vector<2x128xf32>
    %163 = math.exp %162 : vector<2x128xf32>
    %cst_56 = arith.constant 1.000000e+00 : f32
    %164 = vector.broadcast %cst_56 : f32 to vector<2x128xf32>
    %165 = arith.addf %164, %163 : vector<2x128xf32>
    %166 = arith.divf %164, %165 : vector<2x128xf32>
    %167 = vector.extract_strided_slice %166 {offsets = [0, 0], sizes = [2, 32], strides = [1, 1]} : vector<2x128xf32> to vector<2x32xf32>
    %168 = vector.extract_strided_slice %166 {offsets = [0, 32], sizes = [2, 32], strides = [1, 1]} : vector<2x128xf32> to vector<2x32xf32>
    %169 = vector.extract_strided_slice %166 {offsets = [0, 96], sizes = [2, 32], strides = [1, 1]} : vector<2x128xf32> to vector<2x32xf32>
    %170 = vector.extract_strided_slice %161 {offsets = [0, 64], sizes = [2, 32], strides = [1, 1]} : vector<2x128xf32> to vector<2x32xf32>
    %171 = math.tanh %170 : vector<2x32xf32>
    %172 = arith.mulf %168, %102 : vector<2x32xf32>
    %173 = arith.mulf %167, %171 : vector<2x32xf32>
    %174 = arith.addf %172, %173 : vector<2x32xf32>
    %175 = math.tanh %174 : vector<2x32xf32>
    %176 = arith.mulf %169, %175 : vector<2x32xf32>
    %cst_57 = arith.constant dense<0.000000e+00> : vector<2x256xf32>
    %177 = tpu.matmul %176, %3, %cst_57 {dimension_numbers = #tpu.dot_dimension_numbers<[1], [0], [0], [1], [0, 0, 1, 1], [], []>} : vector<2x32xf32>, vector<32x256xf32>, vector<2x256xf32> -> vector<2x256xf32>
    %cst_58 = arith.constant dense<0.000000e+00> : vector<2x128xf32>
    %178 = tpu.matmul %174, %4, %cst_58 {dimension_numbers = #tpu.dot_dimension_numbers<[1], [0], [0], [1], [0, 0, 1, 1], [], []>} : vector<2x32xf32>, vector<32x128xf32>, vector<2x128xf32> -> vector<2x128xf32>
    %179 = vector.extract_strided_slice %177 {offsets = [0, 128], sizes = [2, 32], strides = [1, 1]} : vector<2x256xf32> to vector<2x32xf32>
    %180 = vector.extract_strided_slice %178 {offsets = [0, 0], sizes = [2, 32], strides = [1, 1]} : vector<2x128xf32> to vector<2x32xf32>
    %181 = arith.addf %179, %180 : vector<2x32xf32>
    %182 = vector.shape_cast %181 : vector<2x32xf32> to vector<2x1x32xf32>
    %183 = vector.broadcast %182 : vector<2x1x32xf32> to vector<2x8x32xf32>
    %184 = arith.addf %1, %183 : vector<2x8x32xf32>
    %185 = math.tanh %184 : vector<2x8x32xf32>
    %186 = vector.shape_cast %6 : vector<1x32xf32> to vector<1x1x32xf32>
    %187 = vector.broadcast %186 : vector<1x1x32xf32> to vector<2x8x32xf32>
    %188 = arith.mulf %187, %185 : vector<2x8x32xf32>
    %cst_59 = arith.constant dense<0.000000e+00> : vector<2x8xf32>
    %189 = vector.multi_reduction <add>, %188, %cst_59 [2] : vector<2x8x32xf32> to vector<2x8xf32>
    %cst_60 = arith.constant dense<0xFF800000> : vector<2xf32>
    %190 = vector.multi_reduction <maximumf>, %189, %cst_60 [1] : vector<2x8xf32> to vector<2xf32>
    %191 = vector.shape_cast %190 : vector<2xf32> to vector<2x1xf32>
    %192 = vector.broadcast %191 : vector<2x1xf32> to vector<2x8xf32>
    %193 = arith.subf %189, %192 : vector<2x8xf32>
    %194 = math.exp %193 : vector<2x8xf32>
    %195 = arith.mulf %194, %2 : vector<2x8xf32>
    %cst_61 = arith.constant dense<0.000000e+00> : vector<2xf32>
    %196 = vector.multi_reduction <add>, %195, %cst_61 [1] : vector<2x8xf32> to vector<2xf32>
    %197 = vector.shape_cast %196 : vector<2xf32> to vector<2x1xf32>
    %198 = vector.broadcast %197 : vector<2x1xf32> to vector<2x8xf32>
    %199 = arith.divf %195, %198 : vector<2x8xf32>
    %200 = vector.shape_cast %199 : vector<2x8xf32> to vector<2x8x1xf32>
    %201 = vector.broadcast %200 : vector<2x8x1xf32> to vector<2x8x64xf32>
    %202 = arith.mulf %201, %0 : vector<2x8x64xf32>
    %cst_62 = arith.constant dense<0.000000e+00> : vector<2x64xf32>
    %203 = vector.multi_reduction <add>, %202, %cst_62 [1] : vector<2x8x64xf32> to vector<2x64xf32>
    %cst_63 = arith.constant dense<0.000000e+00> : vector<2x128xf32>
    %204 = tpu.matmul %203, %5, %cst_63 {dimension_numbers = #tpu.dot_dimension_numbers<[1], [0], [0], [1], [0, 0, 1, 1], [], []>} : vector<2x64xf32>, vector<64x128xf32>, vector<2x128xf32> -> vector<2x128xf32>
    %205 = vector.extract_strided_slice %177 {offsets = [0, 160], sizes = [2, 32], strides = [1, 1]} : vector<2x256xf32> to vector<2x32xf32>
    %206 = vector.extract_strided_slice %204 {offsets = [0, 0], sizes = [2, 32], strides = [1, 1]} : vector<2x128xf32> to vector<2x32xf32>
    %207 = arith.addf %205, %206 : vector<2x32xf32>
    %208 = vector.broadcast %7 : vector<1x32xf32> to vector<2x32xf32>
    %209 = arith.addf %207, %208 : vector<2x32xf32>
    %210 = vector.extract_strided_slice %177 {offsets = [0, 192], sizes = [2, 1], strides = [1, 1]} : vector<2x256xf32> to vector<2x1xf32>
    %211 = vector.extract_strided_slice %178 {offsets = [0, 32], sizes = [2, 1], strides = [1, 1]} : vector<2x128xf32> to vector<2x1xf32>
    %212 = arith.addf %210, %211 : vector<2x1xf32>
    %213 = vector.extract_strided_slice %204 {offsets = [0, 32], sizes = [2, 1], strides = [1, 1]} : vector<2x128xf32> to vector<2x1xf32>
    %214 = arith.addf %212, %213 : vector<2x1xf32>
    %215 = arith.index_cast %c2_i32 : i32 to index
    %c0_64 = arith.constant 0 : index
    %c0_65 = arith.constant 0 : index
    %216 = vector.load %arg2[%215, %c0_64, %c0_65] : memref<4x2x1xf32, #tpu.memory_space<vmem>>, vector<1x2x1xf32>
    %217 = vector.shape_cast %216 : vector<1x2x1xf32> to vector<2x1xf32>
    %218 = arith.addf %214, %217 : vector<2x1xf32>
    %219 = arith.negf %218 : vector<2x1xf32>
    %220 = math.exp %219 : vector<2x1xf32>
    %cst_66 = arith.constant 1.000000e+00 : f32
    %221 = vector.broadcast %cst_66 : f32 to vector<2x1xf32>
    %222 = arith.addf %221, %220 : vector<2x1xf32>
    %223 = arith.divf %221, %222 : vector<2x1xf32>
    %224 = tpu.concatenate %209, %199, %223, %8 in 1 : vector<2x32xf32>, vector<2x8xf32>, vector<2x1xf32>, vector<2x87xf32> -> vector<2x128xf32>
    %225 = arith.index_cast %c2_i32 : i32 to index
    %c0_67 = arith.constant 0 : index
    %c0_68 = arith.constant 0 : index
    %226 = vector.load %arg13[%225, %c0_67, %c0_68] : memref<4x2x128xf32, #tpu.memory_space<vmem>>, vector<1x2x128xf32>
    %227 = vector.shape_cast %226 : vector<1x2x128xf32> to vector<2x128xf32>
    %228 = vector.shape_cast %224 : vector<2x128xf32> to vector<1x2x128xf32>
    tpu.vector_store %arg13[%225, %c0_67, %c0_68], %228 {strides = array<i32>} : memref<4x2x128xf32, #tpu.memory_space<vmem>>, vector<1x2x128xf32>,
    %229 = vector.extract_strided_slice %177 {offsets = [0, 0], sizes = [2, 128], strides = [1, 1]} : vector<2x256xf32> to vector<2x128xf32>
    %c3_i32 = arith.constant 3 : i32
    %230 = arith.index_cast %c3_i32 : i32 to index
    %c0_69 = arith.constant 0 : index
    %c0_70 = arith.constant 0 : index
    %231 = vector.load %arg1[%230, %c0_69, %c0_70] : memref<4x2x128xf32, #tpu.memory_space<vmem>>, vector<1x2x128xf32>
    %232 = vector.shape_cast %231 : vector<1x2x128xf32> to vector<2x128xf32>
    %233 = arith.addf %232, %229 : vector<2x128xf32>
    %234 = arith.negf %233 : vector<2x128xf32>
    %235 = math.exp %234 : vector<2x128xf32>
    %cst_71 = arith.constant 1.000000e+00 : f32
    %236 = vector.broadcast %cst_71 : f32 to vector<2x128xf32>
    %237 = arith.addf %236, %235 : vector<2x128xf32>
    %238 = arith.divf %236, %237 : vector<2x128xf32>
    %239 = vector.extract_strided_slice %238 {offsets = [0, 0], sizes = [2, 32], strides = [1, 1]} : vector<2x128xf32> to vector<2x32xf32>
    %240 = vector.extract_strided_slice %238 {offsets = [0, 32], sizes = [2, 32], strides = [1, 1]} : vector<2x128xf32> to vector<2x32xf32>
    %241 = vector.extract_strided_slice %238 {offsets = [0, 96], sizes = [2, 32], strides = [1, 1]} : vector<2x128xf32> to vector<2x32xf32>
    %242 = vector.extract_strided_slice %233 {offsets = [0, 64], sizes = [2, 32], strides = [1, 1]} : vector<2x128xf32> to vector<2x32xf32>
    %243 = math.tanh %242 : vector<2x32xf32>
    %244 = arith.mulf %240, %174 : vector<2x32xf32>
    %245 = arith.mulf %239, %243 : vector<2x32xf32>
    %246 = arith.addf %244, %245 : vector<2x32xf32>
    %247 = math.tanh %246 : vector<2x32xf32>
    %248 = arith.mulf %241, %247 : vector<2x32xf32>
    %cst_72 = arith.constant dense<0.000000e+00> : vector<2x256xf32>
    %249 = tpu.matmul %248, %3, %cst_72 {dimension_numbers = #tpu.dot_dimension_numbers<[1], [0], [0], [1], [0, 0, 1, 1], [], []>} : vector<2x32xf32>, vector<32x256xf32>, vector<2x256xf32> -> vector<2x256xf32>
    %cst_73 = arith.constant dense<0.000000e+00> : vector<2x128xf32>
    %250 = tpu.matmul %246, %4, %cst_73 {dimension_numbers = #tpu.dot_dimension_numbers<[1], [0], [0], [1], [0, 0, 1, 1], [], []>} : vector<2x32xf32>, vector<32x128xf32>, vector<2x128xf32> -> vector<2x128xf32>
    %251 = vector.extract_strided_slice %249 {offsets = [0, 128], sizes = [2, 32], strides = [1, 1]} : vector<2x256xf32> to vector<2x32xf32>
    %252 = vector.extract_strided_slice %250 {offsets = [0, 0], sizes = [2, 32], strides = [1, 1]} : vector<2x128xf32> to vector<2x32xf32>
    %253 = arith.addf %251, %252 : vector<2x32xf32>
    %254 = vector.shape_cast %253 : vector<2x32xf32> to vector<2x1x32xf32>
    %255 = vector.broadcast %254 : vector<2x1x32xf32> to vector<2x8x32xf32>
    %256 = arith.addf %1, %255 : vector<2x8x32xf32>
    %257 = math.tanh %256 : vector<2x8x32xf32>
    %258 = vector.shape_cast %6 : vector<1x32xf32> to vector<1x1x32xf32>
    %259 = vector.broadcast %258 : vector<1x1x32xf32> to vector<2x8x32xf32>
    %260 = arith.mulf %259, %257 : vector<2x8x32xf32>
    %cst_74 = arith.constant dense<0.000000e+00> : vector<2x8xf32>
    %261 = vector.multi_reduction <add>, %260, %cst_74 [2] : vector<2x8x32xf32> to vector<2x8xf32>
    %cst_75 = arith.constant dense<0xFF800000> : vector<2xf32>
    %262 = vector.multi_reduction <maximumf>, %261, %cst_75 [1] : vector<2x8xf32> to vector<2xf32>
    %263 = vector.shape_cast %262 : vector<2xf32> to vector<2x1xf32>
    %264 = vector.broadcast %263 : vector<2x1xf32> to vector<2x8xf32>
    %265 = arith.subf %261, %264 : vector<2x8xf32>
    %266 = math.exp %265 : vector<2x8xf32>
    %267 = arith.mulf %266, %2 : vector<2x8xf32>
    %cst_76 = arith.constant dense<0.000000e+00> : vector<2xf32>
    %268 = vector.multi_reduction <add>, %267, %cst_76 [1] : vector<2x8xf32> to vector<2xf32>
    %269 = vector.shape_cast %268 : vector<2xf32> to vector<2x1xf32>
    %270 = vector.broadcast %269 : vector<2x1xf32> to vector<2x8xf32>
    %271 = arith.divf %267, %270 : vector<2x8xf32>
    %272 = vector.shape_cast %271 : vector<2x8xf32> to vector<2x8x1xf32>
    %273 = vector.broadcast %272 : vector<2x8x1xf32> to vector<2x8x64xf32>
    %274 = arith.mulf %273, %0 : vector<2x8x64xf32>
    %cst_77 = arith.constant dense<0.000000e+00> : vector<2x64xf32>
    %275 = vector.multi_reduction <add>, %274, %cst_77 [1] : vector<2x8x64xf32> to vector<2x64xf32>
    %cst_78 = arith.constant dense<0.000000e+00> : vector<2x128xf32>
    %276 = tpu.matmul %275, %5, %cst_78 {dimension_numbers = #tpu.dot_dimension_numbers<[1], [0], [0], [1], [0, 0, 1, 1], [], []>} : vector<2x64xf32>, vector<64x128xf32>, vector<2x128xf32> -> vector<2x128xf32>
    %277 = vector.extract_strided_slice %249 {offsets = [0, 160], sizes = [2, 32], strides = [1, 1]} : vector<2x256xf32> to vector<2x32xf32>
    %278 = vector.extract_strided_slice %276 {offsets = [0, 0], sizes = [2, 32], strides = [1, 1]} : vector<2x128xf32> to vector<2x32xf32>
    %279 = arith.addf %277, %278 : vector<2x32xf32>
    %280 = vector.broadcast %7 : vector<1x32xf32> to vector<2x32xf32>
    %281 = arith.addf %279, %280 : vector<2x32xf32>
    %282 = vector.extract_strided_slice %249 {offsets = [0, 192], sizes = [2, 1], strides = [1, 1]} : vector<2x256xf32> to vector<2x1xf32>
    %283 = vector.extract_strided_slice %250 {offsets = [0, 32], sizes = [2, 1], strides = [1, 1]} : vector<2x128xf32> to vector<2x1xf32>
    %284 = arith.addf %282, %283 : vector<2x1xf32>
    %285 = vector.extract_strided_slice %276 {offsets = [0, 32], sizes = [2, 1], strides = [1, 1]} : vector<2x128xf32> to vector<2x1xf32>
    %286 = arith.addf %284, %285 : vector<2x1xf32>
    %287 = arith.index_cast %c3_i32 : i32 to index
    %c0_79 = arith.constant 0 : index
    %c0_80 = arith.constant 0 : index
    %288 = vector.load %arg2[%287, %c0_79, %c0_80] : memref<4x2x1xf32, #tpu.memory_space<vmem>>, vector<1x2x1xf32>
    %289 = vector.shape_cast %288 : vector<1x2x1xf32> to vector<2x1xf32>
    %290 = arith.addf %286, %289 : vector<2x1xf32>
    %291 = arith.negf %290 : vector<2x1xf32>
    %292 = math.exp %291 : vector<2x1xf32>
    %cst_81 = arith.constant 1.000000e+00 : f32
    %293 = vector.broadcast %cst_81 : f32 to vector<2x1xf32>
    %294 = arith.addf %293, %292 : vector<2x1xf32>
    %295 = arith.divf %293, %294 : vector<2x1xf32>
    %296 = tpu.concatenate %281, %271, %295, %8 in 1 : vector<2x32xf32>, vector<2x8xf32>, vector<2x1xf32>, vector<2x87xf32> -> vector<2x128xf32>
    %297 = arith.index_cast %c3_i32 : i32 to index
    %c0_82 = arith.constant 0 : index
    %c0_83 = arith.constant 0 : index
    %298 = vector.load %arg13[%297, %c0_82, %c0_83] : memref<4x2x128xf32, #tpu.memory_space<vmem>>, vector<1x2x128xf32>
    %299 = vector.shape_cast %298 : vector<1x2x128xf32> to vector<2x128xf32>
    %300 = vector.shape_cast %296 : vector<2x128xf32> to vector<1x2x128xf32>
    tpu.vector_store %arg13[%297, %c0_82, %c0_83], %300 {strides = array<i32>} : memref<4x2x128xf32, #tpu.memory_space<vmem>>, vector<1x2x128xf32>,
    %301 = vector.extract_strided_slice %249 {offsets = [0, 0], sizes = [2, 128], strides = [1, 1]} : vector<2x256xf32> to vector<2x128xf32>
    %c4_i32 = arith.constant 4 : i32
    %c0_84 = arith.constant 0 : index
    %c0_85 = arith.constant 0 : index
    %302 = vector.load %arg14[%c0_84, %c0_85] : memref<2x32xf32, #tpu.memory_space<vmem>>, vector<2x32xf32>
    tpu.vector_store %arg14[%c0_84, %c0_85], %248 {strides = array<i32>} : memref<2x32xf32, #tpu.memory_space<vmem>>, vector<2x32xf32>,
    %c0_86 = arith.constant 0 : index
    %c0_87 = arith.constant 0 : index
    %303 = vector.load %arg15[%c0_86, %c0_87] : memref<2x32xf32, #tpu.memory_space<vmem>>, vector<2x32xf32>
    tpu.vector_store %arg15[%c0_86, %c0_87], %246 {strides = array<i32>} : memref<2x32xf32, #tpu.memory_space<vmem>>, vector<2x32xf32>,
    return
  }
  func.func @transform_0(%arg0: i32) -> (i32, i32, i32) {
    %c0_i32 = arith.constant 0 : i32
    %c0_i32_0 = arith.constant 0 : i32
    %c0_i32_1 = arith.constant 0 : i32
    %c0_i32_2 = arith.constant 0 : i32
    return %c0_i32, %c0_i32_0, %c0_i32_1 : i32, i32, i32
  }
  func.func @transform_1(%arg0: i32) -> (i32, i32, i32) {
    %c0_i32 = arith.constant 0 : i32
    %c0_i32_0 = arith.constant 0 : i32
    %c0_i32_1 = arith.constant 0 : i32
    %c0_i32_2 = arith.constant 0 : i32
    return %c0_i32, %c0_i32_0, %c0_i32_1 : i32, i32, i32
  }
  func.func @transform_2(%arg0: i32) -> (i32, i32) {
    %c0_i32 = arith.constant 0 : i32
    %c0_i32_0 = arith.constant 0 : i32
    %c0_i32_1 = arith.constant 0 : i32
    return %c0_i32, %c0_i32_0 : i32, i32
  }
  func.func @transform_3(%arg0: i32) -> (i32, i32) {
    %c0_i32 = arith.constant 0 : i32
    %c0_i32_0 = arith.constant 0 : i32
    %c0_i32_1 = arith.constant 0 : i32
    return %c0_i32, %c0_i32_0 : i32, i32
  }
  func.func @transform_4(%arg0: i32) -> (i32, i32, i32) {
    %c0_i32 = arith.constant 0 : i32
    %c0_i32_0 = arith.constant 0 : i32
    %c0_i32_1 = arith.constant 0 : i32
    %c0_i32_2 = arith.constant 0 : i32
    return %c0_i32, %c0_i32_0, %c0_i32_1 : i32, i32, i32
  }
  func.func @transform_5(%arg0: i32) -> (i32, i32, i32) {
    %c0_i32 = arith.constant 0 : i32
    %c0_i32_0 = arith.constant 0 : i32
    %c0_i32_1 = arith.constant 0 : i32
    %c0_i32_2 = arith.constant 0 : i32
    return %c0_i32, %c0_i32_0, %c0_i32_1 : i32, i32, i32
  }
  func.func @transform_6(%arg0: i32) -> (i32, i32) {
    %c0_i32 = arith.constant 0 : i32
    %c0_i32_0 = arith.constant 0 : i32
    %c0_i32_1 = arith.constant 0 : i32
    return %c0_i32, %c0_i32_0 : i32, i32
  }
  func.func @transform_7(%arg0: i32) -> (i32, i32) {
    %c0_i32 = arith.constant 0 : i32
    %c0_i32_0 = arith.constant 0 : i32
    %c0_i32_1 = arith.constant 0 : i32
    return %c0_i32, %c0_i32_0 : i32, i32
  }
  func.func @transform_8(%arg0: i32) -> (i32, i32) {
    %c0_i32 = arith.constant 0 : i32
    %c0_i32_0 = arith.constant 0 : i32
    %c0_i32_1 = arith.constant 0 : i32
    return %c0_i32, %c0_i32_0 : i32, i32
  }
  func.func @transform_9(%arg0: i32) -> (i32, i32) {
    %c0_i32 = arith.constant 0 : i32
    %c0_i32_0 = arith.constant 0 : i32
    %c0_i32_1 = arith.constant 0 : i32
    return %c0_i32, %c0_i32_0 : i32, i32
  }
  func.func @transform_10(%arg0: i32) -> (i32, i32) {
    %c0_i32 = arith.constant 0 : i32
    %c0_i32_0 = arith.constant 0 : i32
    %c0_i32_1 = arith.constant 0 : i32
    return %c0_i32, %c0_i32_0 : i32, i32
  }
  func.func @transform_11(%arg0: i32) -> (i32, i32) {
    %c0_i32 = arith.constant 0 : i32
    %c0_i32_0 = arith.constant 0 : i32
    %c0_i32_1 = arith.constant 0 : i32
    return %c0_i32, %c0_i32_0 : i32, i32
  }
  func.func @transform_12(%arg0: i32) -> (i32, i32, i32) {
    %c0_i32 = arith.constant 0 : i32
    %c0_i32_0 = arith.constant 0 : i32
    %c0_i32_1 = arith.constant 0 : i32
    %c0_i32_2 = arith.constant 0 : i32
    return %c0_i32, %c0_i32_0, %c0_i32_1 : i32, i32, i32
  }
  func.func @transform_13(%arg0: i32) -> (i32, i32) {
    %c0_i32 = arith.constant 0 : i32
    %c0_i32_0 = arith.constant 0 : i32
    %c0_i32_1 = arith.constant 0 : i32
    return %c0_i32, %c0_i32_0 : i32, i32
  }
  func.func @transform_14(%arg0: i32) -> (i32, i32) {
    %c0_i32 = arith.constant 0 : i32
    %c0_i32_0 = arith.constant 0 : i32
    %c0_i32_1 = arith.constant 0 : i32
    return %c0_i32, %c0_i32_0 : i32, i32
  }
}

</mosaic_0001>

<bundles_post_ra>
// kernel: tpu_custom_call.1
= control target key start
LH: loop header
LB: loop body
LE: loop exit
PB: predicated region body
PF: predicated region fallthrough
CT: control target
= control target key end

     0   :  { %20 = vsyncpa [#allocation3], 0  ;;  %s2382_s0 = inlined_call_operand.vmem [shape: f32[4,2,128], index: 0, kind: input, shape index: {}]   ;;  %s2383_s1 = inlined_call_operand.vmem [shape: f32[4,2,1], index: 1, kind: input, shape index: {}]   ;;  %s2384_s2 = inlined_call_operand.vmem [shape: f32[2,32], index: 2, kind: input, shape index: {}]   ;;  %s2385_s3 = inlined_call_operand.vmem [shape: f32[2,32], index: 3, kind: input, shape index: {}]   ;;  %s2386_s4 = inlined_call_operand.hbm [shape: f32[2,8,64], index: 4, kind: input, shape index: {}]   ;;  %s2387_s5 = inlined_call_operand.hbm [shape: f32[2,8,32], index: 5, kind: input, shape index: {}]   ;;  %s2388_s6 = inlined_call_operand.vmem [shape: f32[2,8], index: 6, kind: input, shape index: {}]   ;;  %s2389_s7 = inlined_call_operand.hbm [shape: f32[32,256], index: 7, kind: input, shape index: {}]   ;;  %s2390_s8 = inlined_call_operand.hbm [shape: f32[32,128], index: 8, kind: input, shape index: {}]   ;;  %s2391_s9 = inlined_call_operand.hbm [shape: f32[64,128], index: 9, kind: input, shape index: {}]   ;;  %s2392_s10 = inlined_call_operand.vmem [shape: f32[1,32], index: 10, kind: input, shape index: {}]   ;;  %s2393_s11 = inlined_call_operand.vmem [shape: f32[1,32], index: 11, kind: input, shape index: {}]   ;;  %s2394_s12 = inlined_call_operand.hbm [shape: f32[4,2,128], index: 12, kind: output, shape index: {0}]   ;;  %s2395_s13 = inlined_call_operand.hbm [shape: f32[2,32], index: 13, kind: output, shape index: {1}]   ;;  %s2396_s14 = inlined_call_operand.hbm [shape: f32[2,32], index: 14, kind: output, shape index: {2}]  }
   0x1   :  { %21 = vsyncpa [#allocation6], 0 }
   0x2   :  { %22 = vsyncpa [#allocation9], 0 }
   0x3   :  { %23 = vsyncpa [#allocation4], 0 }
   0x4   :  { %24 = vsyncpa [#allocation13], 0  ;;  %s50_s15 = sshll.u32 %s2387_s5, 4  ;;  %s1829_s16 = smov [#allocation5]   ;;  %s51_s15 = int_to_ptr.hbm [resolvable:$true] %s50_s15 }
   0x5   :  { %s52_s17 = sshll.u32 %s1829_s16, 4  ;;  %s78_s20 = sshll.u32 %s2390_s8, 4  ;;  %s53_s17 = int_to_ptr.vmem [resolvable:$true] %s52_s17  ;;  %s79_s20 = int_to_ptr.hbm [resolvable:$true] %s78_s20 }
   0x6   :  { %s1830_s21 = smov 128   ;;  %s1831_s22 = smov 8  }
   0x7   :  { %58 = dma.hbm_to_vmem [thread:$0]  %s51_s15, 256, %s53_s17, [#allocation6], %s1830_s21, %s1830_s21, %s1831_s22  }
   0x8   :  { %s1832_s23 = smov [#allocation8]   ;;  %s37_s5 = sshll.u32 %s2386_s4, 4  ;;  %s38_s5 = int_to_ptr.hbm [resolvable:$true] %s37_s5 }
   0x9   :  { %s80_s24 = sshll.u32 %s1832_s23, 4  ;;  %s65_s28 = sshll.u32 %s2389_s7, 4  ;;  %s81_s24 = int_to_ptr.vmem [resolvable:$true] %s80_s24  ;;  %s66_s28 = int_to_ptr.hbm [resolvable:$true] %s65_s28 }
   0xa   :  { %86 = dma.hbm_to_vmem [thread:$0]  %s79_s20, 512, %s81_s24, [#allocation9], %s1830_s21, %s1830_s21, %s1831_s22  }
   0xb   :  { %s1833_s29 = smov [#allocation2]   ;;  %s1834_s15 = smov [#allocation7]  }
   0xc   :  { %s39_s30 = sshll.u32 %s1833_s29, 4  ;;  %s67_s4 = sshll.u32 %s1834_s15, 4  ;;  %s40_s30 = int_to_ptr.vmem [resolvable:$true] %s39_s30  ;;  %s68_s4 = int_to_ptr.vmem [resolvable:$true] %s67_s4 }
   0xd   :  { %45 = dma.hbm_to_vmem [thread:$0]  %s38_s5, 256, %s40_s30, [#allocation3], %s1830_s21, %s1830_s21, %s1831_s22  }
   0xe   :  { %s1835_s16 = smov 256   ;;  %s1836_s17 = smov 16  }
   0xf   :  { %73 = dma.hbm_to_vmem [thread:$0]  %s66_s28, 1024, %s68_s4, [#allocation6], %s1835_s16, %s1835_s16, %s1836_s17  }
  0x10   :  { %s91_s20 = sshll.u32 %s2391_s9, 4  ;;  %s1837_s7 = smov [#allocation10]   ;;  %s92_s20 = int_to_ptr.hbm [resolvable:$true] %s91_s20 }
  0x11   :  { %s93_s23 = sshll.u32 %s1837_s7, 4  ;;  %s94_s23 = int_to_ptr.vmem [resolvable:$true] %s93_s23 }
  0x12   :  { %99 = dma.hbm_to_vmem [thread:$0]  %s92_s20, 1024, %s94_s23, [#allocation9], %s1830_s21, %s1830_s21, %s1831_s22  }
  0x13   :  { %1819 = dma.done.wait [#allocation3], 256  }
  0x14   :  { %1820 = vsyncadd [#allocation3], 4294967040 }
  0x15   :  { %1821 = dma.done.wait [#allocation6], 1280  }
  0x16   :  { %1822 = vsyncadd [#allocation6], 4294966016 }
  0x17   :  { %1823 = dma.done.wait [#allocation9], 1536  }
  0x18   :  { %1824 = vsyncadd [#allocation9], 4294965760  ;;  %v1949_v0 = vld [vmem:[#allocation7 + $0x30] sm:$0xff]  ;;  %v1951_v1 = vld [vmem:[#allocation7 + $0x20] sm:$0xff]  ;;  %vm152_vm0 = vcmask 261120   ;;  %s1839_s5 = smov 32  }
  0x19   :  { %168 = vmatpush.msra.mxu0 %v1949_v0  ;;  %237 = vmatpush.msra.mxu3 %v1949_v0  ;;  %v1955_v2 = vld [vmem:[#allocation7 + $0x10] sm:$0xff]  ;;  %v1960_v3 = vld [vmem:[#allocation7] sm:$0xff]  ;;  %v1983_v30 = vld [vmem:[#allocation7 + $0x38] sm:$0xff]  ;;  %s1840_s27 = smov 96   ;;  %vm318_vm13 = vcmask 1041409   ;;  %vm321_vm14 = vcmask 58368  }
  0x1a   :  { %575 = vmatpush.msra.mxu1 %v1949_v0  ;;  %v151_v4 = vld [vmem:[%s2384_s2] sm:$0x3]  ;;  %s1838_s2 = smov 64   ;;  %v1985_v31 = vld [vmem:[#allocation7 + $0x28] sm:$0xff]  ;;  %257 = vmatpush.msra.mxu2 %v1983_v30  ;;  %v1988_v32 = vld [vmem:[#allocation7 + $0x18] sm:$0xff]  ;;  %s1444_s26 = sshll.u32 %s2395_s13, 4  ;;  %s1445_s26 = int_to_ptr.hbm [resolvable:$true] %s1444_s26 }
  0x1b   :  { %169 = vmatpush.msra.mxu0 %v1951_v1  ;;  %238 = vmatpush.msra.mxu3 %v1951_v1  ;;  %v177_v5 = vld [vmem:[%s2382_s0] sm:$0x3]  ;;  %v1991_v33 = vld [vmem:[#allocation7 + $0x8] sm:$0xff]  ;;  %v1483_v37 = vld [vmem:[%s2382_s0 + $0x2] sm:$0x3]  ;;  %s1844_s28 = smov [#allocation14]  }
  0x1c   :  { %576 = vmatpush.msra.mxu1 %v1951_v1  ;;  %v176_v9 = vld [vmem:[%s2385_s3] sm:$0x3]  ;;  %258 = vmatpush.msra.mxu2 %v1985_v31  ;;  %v2016_v60 = vld [vmem:[#allocation8 + $0x18] sm:$0xff]  ;;  %v2019_v61 = vld [vmem:[#allocation8 + $0x10] sm:$0xff]  ;;  %s1453_s29 = sshll.u32 %s1844_s28, 4  ;;  %s1430_s30 = sshll.u32 %s2394_s12, 4  ;;  %s1454_s29 = int_to_ptr.vmem [resolvable:$true] %s1453_s29  ;;  %s1431_s30 = int_to_ptr.hbm [resolvable:$true] %s1430_s30 }
  0x1d   :  { %170 = vmatpush.msra.mxu0 %v1955_v2  ;;  %239 = vmatpush.msra.mxu3 %v1955_v2  ;;  %v2021_v62 = vld [vmem:[#allocation8 + $0x8] sm:$0xff]  ;;  %v2024_v63 = vld [vmem:[#allocation8] sm:$0xff]  ;;  %s1845_s15 = smov [#allocation11]   ;;  %s1846_s4 = smov 2  }
  0x1e   :  { %577 = vmatpush.msra.mxu1 %v1955_v2  ;;  %259 = vmatpush.msra.mxu2 %v1988_v32 }
  0x1f   :  { %171 = vmatpush.msra.mxu0 %v1960_v3  ;;  %240 = vmatpush.msra.mxu3 %v1960_v3 }
  0x20   :  { %1476 = vmatmul.msk.f32.vlgmr.msra.gmra.mxu0 %vm152_vm0, %v151_v4  ;;  %578 = vmatpush.msra.mxu1 %v1960_v3  ;;  %v1491_v4 = vld [vmem:[%s2382_s0 + $0x4] sm:$0x3] }
  0x21   :  { %260 = vmatpush.msra.mxu2 %v1991_v33  ;;  %282 = vmatpush.msrb.mxu3 %v2016_v60 }
  0x23   :  { %595 = vmatpush.msrb.mxu2 %v1983_v30  ;;  %283 = vmatpush.msrb.mxu3 %v2019_v61 }
  0x25   :  { %596 = vmatpush.msrb.mxu2 %v1985_v31  ;;  %284 = vmatpush.msrb.mxu3 %v2021_v62 }
  0x27   :  { %597 = vmatpush.msrb.mxu2 %v1988_v32  ;;  %285 = vmatpush.msrb.mxu3 %v2024_v63 }
  0x29   :  { %598 = vmatpush.msrb.mxu2 %v1991_v33 }
  0x9d   :  { %v173_v6 = vpop.f32.mrf.mxu0 }
  0x9e   :  { %v178_v7 = vadd.f32 %v177_v5, %v173_v6 }
  0xa0   :  { %1531 = vtanh.f32 %v178_v7  ;;  %v1477_v10 = vmul.f32 -1.442695, %v178_v7 }
  0xa2   :  { %1533 = vpow2.f32 %v1477_v10 }
  0xa6   :  { %v1532_v8 = vpop.eup %1531 }
  0xa7   :  { %205 = vrot.lane.b32.xlu0 %v1532_v8, %s1838_s2 }
  0xa8   :  { %v1534_v11 = vpop.eup %1533 }
  0xa9   :  { %v182_v12 = vadd.f32 1.0, %v1534_v11 }
  0xab   :  { %1535 = vrcp.f32 %v182_v12  ;;  %v194_v18 = vand.u32 2147483648, %v182_v12  ;;  %vm188_vm2 = vweird.f32 %v182_v12  ;;  %v192_v19 = vand.u32 2147483647, %v182_v12 }
  0xad   :  { %v195_v21 = vor.u32 1.1754944e-38, %v194_v18  ;;  %vm193_vm4 = vcmp.eq.f32.partialorder %v192_v19, 8.507059e+37 }
  0xaf   :  { %200 = vrot.lane.b32.xlu0 %v176_v9, %s1839_s5 }
  0xb1   :  { %v1536_v13 = vpop.eup %1535 }
  0xb2   :  { %v184_v14 = vmul.f32 %v1536_v13, %v182_v12  ;;  %vm189_vm1 = vweird.f32 %v1536_v13 }
  0xb3   :  { %vm190_vm3 = vmor %vm188_vm2, %vm189_vm1 }
  0xb4   :  { %v185_v15 = vsub.f32 1.0, %v184_v14 }
  0xb6   :  { %v186_v16 = vmul.f32 %v1536_v13, %v185_v15 }
  0xb8   :  { %v187_v17 = vadd.f32 %v1536_v13, %v186_v16 }
  0xba   :  { %v191_v20 = vsel %vm190_vm3, %v1536_v13, %v187_v17 }
  0xbb   :  { %v196_v23 = vsel %vm193_vm4, %v195_v21, %v191_v20 }
 0x119   :  { %v206_v22 = vpop.permute.xlu0 %205 }
 0x11a   :  { %v208_v24 = vmul.f32 %v206_v22, %v196_v23 }
 0x11c   :  { %210 = vrot.lane.b32.xlu1 %v208_v24, %s1839_s5 }
 0x121   :  { %v201_v25 = vpop.permute.xlu0 %200 }
 0x122   :  { %v203_v26 = vmul.f32 %v201_v25, %v196_v23 }
 0x18e   :  { %v211_v27 = vpop.permute.xlu1 %210 }
 0x18f   :  { %v213_v28 = vadd.f32 %v211_v27, %v203_v26  ;;  %v2051_v27 = vld [vmem:[#allocation5] sm:$0xff] }
 0x191   :  { %1537 = vtanh.f32 %v213_v28 }
 0x197   :  { %v1538_v29 = vpop.eup %1537 }
 0x198   :  { %216 = vrot.lane.b32.xlu1 %v1538_v29, %s1838_s2  ;;  %v2057_v29 = vld [vmem:[%s2392_s10] ss:$0 sm:$0xff]  ;;  %s1428_s10 = sshll.u32 %s1845_s15, 4  ;;  %s1429_s10 = int_to_ptr.vmem [resolvable:$true] %s1428_s10 }
 0x20a   :  { %v217_v34 = vpop.permute.xlu1 %216 }
 0x20b   :  { %v219_v35 = vmul.f32 %v217_v34, %v196_v23 }
 0x20d   :  { %221 = vrot.lane.b32.xlu2 %v219_v35, %s1839_s5 }
 0x267   :  { %v222_v36 = vpop.permute.xlu2 %221 }
 0x268   :  { %1478 = vmatmul.msk.f32.vlgmr.msra.gmra.mxu3 %vm152_vm0, %v222_v36  ;;  %1479 = vmatmul.msk.f32.vlgmr.msra.gmra.mxu2 %vm152_vm0, %v222_v36 }
 0x269   :  { %882 = vmatpush.msra.mxu2 %v1949_v0  ;;  %620 = vmatpush.msra.mxu3 %v2016_v60 }
 0x26b   :  { %883 = vmatpush.msra.mxu2 %v1951_v1  ;;  %621 = vmatpush.msra.mxu3 %v2019_v61 }
 0x26d   :  { %884 = vmatpush.msra.mxu2 %v1955_v2  ;;  %622 = vmatpush.msra.mxu3 %v2021_v62 }
 0x26f   :  { %885 = vmatpush.msra.mxu2 %v1960_v3  ;;  %623 = vmatpush.msra.mxu3 %v2024_v63 }
 0x2eb   :  { %v242_v38 = vpop.f32.mrf.mxu3  ;;  %v2047_v24 = vpop.f32.mrf.mxu2 }
 0x2ec   :  { %v520_v39 = vadd.f32 %v1483_v37, %v242_v38 }
 0x2ee   :  { %1539 = vtanh.f32 %v520_v39  ;;  %v1484_v41 = vmul.f32 -1.442695, %v520_v39 }
 0x2f0   :  { %1541 = vpow2.f32 %v1484_v41 }
 0x2f4   :  { %v1540_v40 = vpop.eup %1539 }
 0x2f5   :  { %543 = vrot.lane.b32.xlu2 %v1540_v40, %s1838_s2 }
 0x2f6   :  { %v1542_v42 = vpop.eup %1541 }
 0x2f7   :  { %v524_v43 = vadd.f32 1.0, %v1542_v42 }
 0x2f9   :  { %1543 = vrcp.f32 %v524_v43  ;;  %v536_v49 = vand.u32 2147483648, %v524_v43  ;;  %vm530_vm6 = vweird.f32 %v524_v43  ;;  %v534_v50 = vand.u32 2147483647, %v524_v43 }
 0x2fb   :  { %v537_v52 = vor.u32 1.1754944e-38, %v536_v49  ;;  %vm535_vm8 = vcmp.eq.f32.partialorder %v534_v50, 8.507059e+37  ;;  %v314_v50 = vlaneseq }
 0x2ff   :  { %v1544_v44 = vpop.eup %1543 }
 0x300   :  { %v526_v45 = vmul.f32 %v1544_v44, %v524_v43  ;;  %vm531_vm5 = vweird.f32 %v1544_v44  ;;  %v2066_v43 = vld [vmem:[#allocation5 + $0x8] sm:$0xff] }
 0x301   :  { %vm532_vm7 = vmor %vm530_vm6, %vm531_vm5 }
 0x302   :  { %v527_v46 = vsub.f32 1.0, %v526_v45 }
 0x304   :  { %v528_v47 = vmul.f32 %v1544_v44, %v527_v46 }
 0x306   :  { %v529_v48 = vadd.f32 %v1544_v44, %v528_v47 }
 0x308   :  { %v533_v51 = vsel %vm532_vm7, %v1544_v44, %v529_v48 }
 0x309   :  { %v538_v54 = vsel %vm535_vm8, %v537_v52, %v533_v51  ;;  %v339_v51 = vshrl.u32 %v314_v50, 7  ;;  %v128_v52 = vld [vmem:[%s2388_s6] sm:$0x3] }
 0x30a   :  { %v541_v56 = vmul.f32 %v538_v54, %v213_v28 }
 0x30b   :  { %1525 = vset.pattern.permute.xlu0 %v339_v51  ;;  %1524 = vset.pattern.permute.xlu2 %v339_v51 }
 0x34f   :  { %v544_v53 = vpop.permute.xlu2 %543 }
 0x350   :  { %v546_v55 = vmul.f32 %v544_v53, %v538_v54  ;;  %v344_v53 = vperm.slane %v128_v52, 1 }
 0x352   :  { %548 = vrot.lane.b32.xlu0 %v546_v55, %s1839_s5  ;;  %v2075_v55 = vand.u32 127, %v314_v50 }
 0x3c4   :  { %v549_v57 = vpop.permute.xlu0 %548 }
 0x3c5   :  { %v2011_v58 = vadd.f32 %v549_v57, %v541_v56 }
 0x3c7   :  { %1545 = vtanh.f32 %v2011_v58 }
 0x3cd   :  { %v1546_v59 = vpop.eup %1545 }
 0x3ce   :  { %554 = vrot.lane.b32.xlu1 %v1546_v59, %s1838_s2 }
 0x3d6   :  { %266 = vrot.lane.b32.xlu1 %v213_v28, %s1840_s27 }
 0x440   :  { %v555_v0 = vpop.permute.xlu1 %554 }
 0x441   :  { %v557_v1 = vmul.f32 %v555_v0, %v538_v54  ;;  %v337_v54 = vperm.slane %v128_v52, 0 }
 0x443   :  { %559 = vrot.lane.b32.xlu2 %v557_v1, %s1839_s5 }
 0x448   :  { %v267_v2 = vpop.permute.xlu1 %266 }
 0x449   :  { %1480 = vmatmul.msk.f32.vlgmr.msrb.gmra.mxu3 %vm152_vm0, %v267_v2 }
 0x44a   :  { %902 = vmatpush.msrb.mxu3 %v1983_v30 }
 0x44c   :  { %903 = vmatpush.msrb.mxu3 %v1985_v31 }
 0x44e   :  { %904 = vmatpush.msrb.mxu3 %v1988_v32 }
 0x450   :  { %905 = vmatpush.msrb.mxu3 %v1991_v33 }
 0x49d   :  { %v560_v3 = vpop.permute.xlu2 %559 }
 0x49e   :  { %1485 = vmatmul.msk.f32.vlgmr.msra.gmra.mxu1 %vm152_vm0, %v560_v3  ;;  %1486 = vmatmul.msk.f32.vlgmr.msrb.gmra.mxu2 %vm152_vm0, %v560_v3 }
 0x4cc   :  { %v2045_v23 = vpop.f32.mrf.mxu3 }
 0x4cd   :  { %v290_v25 = vadd.f32 %v2045_v23, %v2047_v24 }
 0x4cf   :  { %v293_v26 = vperm.slane %v290_v25, 0  ;;  %v292_v41 = vrot.slane %v290_v25, 1 }
 0x4d1   :  { %v297_v28 = vadd.f32 %v293_v26, %v2051_v27  ;;  %v294_v42 = vperm.slane %v292_v41, 0 }
 0x4d3   :  { %v298_v44 = vadd.f32 %v294_v42, %v2066_v43 }
 0x51b   :  { %v580_v5 = vpop.f32.mrf.mxu1 }
 0x51c   :  { %v827_v6 = vadd.f32 %v1491_v4, %v580_v5  ;;  %v1841_v4 = vmov 0  }
 0x51d   :  { %1526 = vset.pattern.permute.xlu1 %v1841_v4 }
 0x51e   :  { %1547 = vtanh.f32 %v827_v6  ;;  %v1492_v8 = vmul.f32 -1.442695, %v827_v6 }
 0x520   :  { %1549 = vpow2.f32 %v1492_v8 }
 0x524   :  { %v1548_v7 = vpop.eup %1547 }
 0x525   :  { %850 = vrot.lane.b32.xlu0 %v1548_v7, %s1838_s2 }
 0x526   :  { %v1550_v9 = vpop.eup %1549 }
 0x527   :  { %v831_v10 = vadd.f32 1.0, %v1550_v9 }
 0x529   :  { %1551 = vrcp.f32 %v831_v10  ;;  %v843_v16 = vand.u32 2147483648, %v831_v10  ;;  %vm837_vm10 = vweird.f32 %v831_v10  ;;  %v841_v17 = vand.u32 2147483647, %v831_v10 }
 0x52a   :  { %1553 = vtanh.f32 %v297_v28 }
 0x52b   :  { %v844_v19 = vor.u32 1.1754944e-38, %v843_v16  ;;  %vm842_vm12 = vcmp.eq.f32.partialorder %v841_v17, 8.507059e+37 }
 0x52f   :  { %v1552_v11 = vpop.eup %1551 }
 0x530   :  { %v833_v12 = vmul.f32 %v1552_v11, %v831_v10  ;;  %vm838_vm9 = vweird.f32 %v1552_v11  ;;  %v1554_v34 = vpop.eup %1553 }
 0x531   :  { %vm839_vm11 = vmor %vm837_vm10, %vm838_vm9  ;;  %v304_v35 = vmul.f32 %v1554_v34, %v2057_v29 }
 0x532   :  { %v834_v13 = vsub.f32 1.0, %v833_v12 }
 0x533   :  { %v306_v36 = vsel %vm152_vm0, %v304_v35, 0.0 }
 0x534   :  { %v835_v14 = vmul.f32 %v1552_v11, %v834_v13 }
 0x536   :  { %v836_v15 = vadd.f32 %v1552_v11, %v835_v14 }
 0x538   :  { %v840_v18 = vsel %vm839_vm11, %v1552_v11, %v836_v15 }
 0x539   :  { %v845_v21 = vsel %vm842_vm12, %v844_v19, %v840_v18  ;;  %v2094_v18 = vpop.f32.mrf.mxu2  ;;  %v1499_v19 = vld [vmem:[%s2382_s0 + $0x6] sm:$0x3]  ;;  %vm1420_vm12 = vcmask 254976  }
 0x53a   :  { %v848_v37 = vmul.f32 %v845_v21, %v2011_v58 }
 0x597   :  { %v851_v20 = vpop.permute.xlu0 %850 }
 0x598   :  { %v853_v22 = vmul.f32 %v851_v20, %v845_v21 }
 0x59a   :  { %855 = vrot.lane.b32.xlu2 %v853_v22, %s1839_s5 }
 0x5c3   :  { %307 = vadd.xlane.f32.xlu2 %v306_v36 }
 0x5db   :  { %342 = vperm.xlu2 %1524, %v337_v54  }
 0x5e3   :  { %1527 = vset.pattern.permute.xlu2 %v1841_v4 }
 0x5f4   :  { %v856_v38 = vpop.permute.xlu2 %855 }
 0x5f5   :  { %v2062_v39 = vadd.f32 %v856_v38, %v848_v37 }
 0x5f7   :  { %1555 = vtanh.f32 %v2062_v39 }
 0x5f8   :  { %1557 = vtanh.f32 %v298_v44 }
 0x5fd   :  { %v1556_v40 = vpop.eup %1555 }
 0x5fe   :  { %861 = vrot.lane.b32.xlu0 %v1556_v40, %s1838_s2  ;;  %v1558_v45 = vpop.eup %1557 }
 0x5ff   :  { %v305_v46 = vmul.f32 %v1558_v45, %v2057_v29 }
 0x601   :  { %v309_v47 = vsel %vm152_vm0, %v305_v46, 0.0 }
 0x628   :  { %310 = vadd.xlane.f32.xlu0 %v309_v47 }
 0x636   :  { %v308_v56 = vpop.xlane.xlu2 %307 }
 0x637   :  { %v316_v59 = vperm.slane %v308_v56, %v2075_v55 }
 0x63c   :  { %349 = vperm.xlu0 %1525, %v344_v53  }
 0x63e   :  { %v2085_v12 = vpop.permute.xlu2 %342 }
 0x644   :  { %1528 = vset.pattern.permute.xlu0 %v1841_v4 }
 0x670   :  { %v862_v48 = vpop.permute.xlu0 %861 }
 0x671   :  { %v864_v49 = vmul.f32 %v862_v48, %v845_v21 }
 0x673   :  { %866 = vrot.lane.b32.xlu1 %v864_v49, %s1839_s5 }
 0x69b   :  { %v311_v57 = vpop.xlane.xlu0 %310 }
 0x69c   :  { %v317_v0 = vperm.slane %v311_v57, %v2075_v55 }
 0x69e   :  { %v319_v1 = vsel %vm318_vm13, %v317_v0, %v316_v59 }
 0x69f   :  { %v322_v2 = vsel %vm321_vm14, %v319_v1, -inf }
 0x6a0   :  { %323 = vmax.xlane.f32.xlu1 %v322_v2 }
 0x6ae   :  { %v2087_v13 = vpop.permute.xlu0 %349 }
 0x6e5   :  { %v2081_v3 = vpop.permute.xlu1 %866 }
 0x6e6   :  { %1493 = vmatmul.msk.f32.vlgmr.msra.gmra.mxu2 %vm152_vm0, %v2081_v3 }
 0x713   :  { %v324_v5 = vpop.xlane.xlu1 %323 }
 0x714   :  { %v326_v6 = vperm.slane %v324_v5, 0  ;;  %v327_v7 = vperm.slane %v324_v5, 1 }
 0x716   :  { %v330_v8 = vsub.f32 %v308_v56, %v326_v6  ;;  %v331_v9 = vsub.f32 %v311_v57, %v327_v7 }
 0x718   :  { %v332_v10 = vmul.f32 1.442695, %v330_v8  ;;  %v334_v11 = vmul.f32 1.442695, %v331_v9 }
 0x71a   :  { %1559 = vpow2.f32 %v332_v10 }
 0x71b   :  { %1561 = vpow2.f32 %v334_v11 }
 0x720   :  { %v1560_v14 = vpop.eup %1559 }
 0x721   :  { %v1562_v15 = vpop.eup %1561  ;;  %v353_v16 = vmul.f32 %v1560_v14, %v2085_v12 }
 0x722   :  { %v2091_v17 = vmul.f32 %v1562_v15, %v2087_v13 }
 0x723   :  { %358 = vperm.xlu1 %1526, %v353_v16  }
 0x724   :  { %361 = vperm.xlu2 %1527, %v2091_v17  }
 0x769   :  { %v887_v20 = vpop.f32.mrf.mxu2 }
 0x76a   :  { %v1134_v21 = vadd.f32 %v1499_v19, %v887_v20 }
 0x76c   :  { %1563 = vtanh.f32 %v1134_v21  ;;  %v1500_v37 = vmul.f32 -1.442695, %v1134_v21 }
 0x76e   :  { %1565 = vpow2.f32 %v1500_v37 }
 0x772   :  { %v1564_v22 = vpop.eup %1563 }
 0x773   :  { %1157 = vrot.lane.b32.xlu2 %v1564_v22, %s1838_s2 }
 0x774   :  { %v1566_v38 = vpop.eup %1565 }
 0x775   :  { %v1138_v40 = vadd.f32 1.0, %v1566_v38  ;;  %v148_v38 = vld [vmem:[#allocation10 + $0x38] sm:$0xff] }
 0x776   :  { %445 = vmatpush.msrb.mxu0 %v148_v38  ;;  %758 = vmatpush.msrb.mxu1 %v148_v38 }
 0x777   :  { %1567 = vrcp.f32 %v1138_v40  ;;  %v1150_v47 = vand.u32 2147483648, %v1138_v40  ;;  %vm1144_vm1 = vweird.f32 %v1138_v40  ;;  %v1148_v48 = vand.u32 2147483647, %v1138_v40  ;;  %1065 = vmatpush.msrb.mxu2 %v148_v38 }
 0x779   :  { %v1151_v50 = vor.u32 1.1754944e-38, %v1150_v47  ;;  %vm1149_vm3 = vcmp.eq.f32.partialorder %v1148_v48, 8.507059e+37  ;;  %v2121_v47 = vld [vmem:[#allocation2] sm:$0xff] }
 0x77d   :  { %v1568_v41 = vpop.eup %1567 }
 0x77e   :  { %v362_v25 = vpop.permute.xlu2 %361  ;;  %v1140_v42 = vmul.f32 %v1568_v41, %v1138_v40  ;;  %vm1145_vm15 = vweird.f32 %v1568_v41  ;;  %v147_v40 = vld [vmem:[#allocation10 + $0x30] sm:$0xff] }
 0x77f   :  { %v364_v28 = vperm.slane %v362_v25, %v2075_v55  ;;  %vm1146_vm2 = vmor %vm1144_vm1, %vm1145_vm15  ;;  %446 = vmatpush.msrb.mxu0 %v147_v40  ;;  %759 = vmatpush.msrb.mxu1 %v147_v40  ;;  %vm417_vm15 = vcmask 523264  }
 0x780   :  { %v1141_v44 = vsub.f32 1.0, %v1140_v42  ;;  %1066 = vmatpush.msrb.mxu2 %v147_v40  ;;  %v145_v42 = vld [vmem:[#allocation10 + $0x20] sm:$0xff] }
 0x782   :  { %v1142_v45 = vmul.f32 %v1568_v41, %v1141_v44  ;;  %v143_v44 = vld [vmem:[#allocation10 + $0x10] sm:$0xff] }
 0x784   :  { %v1143_v46 = vadd.f32 %v1568_v41, %v1142_v45  ;;  %v142_v45 = vld [vmem:[#allocation10 + $0x8] sm:$0xff] }
 0x786   :  { %v1147_v49 = vsel %vm1146_vm2, %v1568_v41, %v1143_v46  ;;  %v146_v41 = vld [vmem:[#allocation10 + $0x28] sm:$0xff]  ;;  %v141_v46 = vld [vmem:[#allocation10] sm:$0xff] }
 0x787   :  { %v2104_v51 = vsel %vm1149_vm3, %v1151_v50, %v1147_v49  ;;  %447 = vmatpush.msrb.mxu0 %v146_v41  ;;  %760 = vmatpush.msrb.mxu1 %v146_v41 }
 0x788   :  { %v1155_v19 = vmul.f32 %v2104_v51, %v2062_v39  ;;  %1067 = vmatpush.msrb.mxu2 %v146_v41 }
 0x789   :  { %448 = vmatpush.msrb.mxu0 %v145_v42  ;;  %761 = vmatpush.msrb.mxu1 %v145_v42 }
 0x78a   :  { %1068 = vmatpush.msrb.mxu2 %v145_v42 }
 0x795   :  { %v359_v26 = vpop.permute.xlu1 %358 }
 0x796   :  { %v363_v34 = vperm.slane %v359_v26, %v2075_v55 }
 0x798   :  { %v365_v35 = vsel %vm318_vm13, %v364_v28, %v363_v34 }
 0x799   :  { %v367_v36 = vsel %vm321_vm14, %v365_v35, 0.0 }
 0x79c   :  { %368 = vadd.xlane.f32.xlu2 %v367_v36 }
 0x7cd   :  { %v1158_v52 = vpop.permute.xlu2 %1157 }
 0x7ce   :  { %v1160_v53 = vmul.f32 %v1158_v52, %v2104_v51 }
 0x7d0   :  { %1162 = vrot.lane.b32.xlu1 %v1160_v53, %s1839_s5 }
 0x80f   :  { %v369_v54 = vpop.xlane.xlu2 %368 }
 0x810   :  { %v371_v56 = vperm.slane %v369_v54, 0  ;;  %v372_v10 = vperm.slane %v369_v54, 1 }
 0x812   :  { %1569 = vrcp.f32 %v371_v56  ;;  %v386_v1 = vand.u32 2147483648, %v371_v56  ;;  %v384_v4 = vand.u32 2147483647, %v371_v56  ;;  %vm380_vm5 = vweird.f32 %v371_v56 }
 0x813   :  { %1571 = vrcp.f32 %v372_v10  ;;  %vm395_vm9 = vweird.f32 %v372_v10  ;;  %v399_v26 = vand.u32 2147483647, %v372_v10 }
 0x814   :  { %v387_v6 = vor.u32 1.1754944e-38, %v386_v1  ;;  %vm385_vm7 = vcmp.eq.f32.partialorder %v384_v4, 8.507059e+37 }
 0x815   :  { %vm400_vm11 = vcmp.eq.f32.partialorder %v399_v26, 8.507059e+37 }
 0x818   :  { %v1570_v57 = vpop.eup %1569 }
 0x819   :  { %v376_v59 = vmul.f32 %v1570_v57, %v371_v56  ;;  %vm381_vm4 = vweird.f32 %v1570_v57  ;;  %v1572_v11 = vpop.eup %1571  ;;  %v2134_v56 = vadd.s32 4294967264, %v2075_v55 }
 0x81a   :  { %vm382_vm6 = vmor %vm380_vm5, %vm381_vm4  ;;  %v391_v14 = vmul.f32 %v1572_v11, %v372_v10  ;;  %vm396_vm8 = vweird.f32 %v1572_v11 }
 0x81b   :  { %v377_v0 = vsub.f32 1.0, %v376_v59  ;;  %vm397_vm10 = vmor %vm395_vm9, %vm396_vm8  ;;  %v2136_v59 = vld [vmem:[#allocation2 + $0x8] sm:$0xff] }
 0x81c   :  { %v392_v15 = vsub.f32 1.0, %v391_v14 }
 0x81d   :  { %v378_v2 = vmul.f32 %v1570_v57, %v377_v0 }
 0x81e   :  { %v393_v22 = vmul.f32 %v1572_v11, %v392_v15 }
 0x81f   :  { %v379_v5 = vadd.f32 %v1570_v57, %v378_v2 }
 0x820   :  { %v394_v25 = vadd.f32 %v1572_v11, %v393_v22 }
 0x821   :  { %v383_v7 = vsel %vm382_vm6, %v1570_v57, %v379_v5 }
 0x822   :  { %v388_v8 = vsel %vm385_vm7, %v387_v6, %v383_v7  ;;  %v398_v34 = vsel %vm397_vm10, %v1572_v11, %v394_v25 }
 0x823   :  { %v389_v9 = vmul.f32 %v388_v8, %v353_v16  ;;  %v401_v16 = vand.u32 2147483648, %v372_v10 }
 0x825   :  { %407 = vperm.xlu0 %1528, %v389_v9   ;;  %v402_v35 = vor.u32 1.1754944e-38, %v401_v16 }
 0x827   :  { %v403_v36 = vsel %vm400_vm11, %v402_v35, %v398_v34 }
 0x82d   :  { %911 = vrot.lane.b32.xlu0 %v2062_v39, %s1840_s27  ;;  %v404_v39 = vmul.f32 %v403_v36, %v2091_v17 }
 0x842   :  { %v1163_v20 = vpop.permute.xlu1 %1162 }
 0x843   :  { %v1165_v21 = vadd.f32 %v1163_v20, %v1155_v19 }
 0x845   :  { %1573 = vtanh.f32 %v1165_v21  ;;  %1198 = vrot.lane.b32.xlu0 %v1165_v21, %s1840_s27 }
 0x84b   :  { %v1574_v28 = vpop.eup %1573 }
 0x84c   :  { %1168 = vrot.lane.b32.xlu1 %v1574_v28, %s1838_s2 }
 0x854   :  { %412 = vperm.xlu1 %1526, %v404_v39  }
 0x85c   :  { %604 = vrot.lane.b32.xlu1 %v2011_v58, %s1840_s27  ;;  %v144_v58 = vld [vmem:[#allocation10 + $0x18] sm:$0xff] }
 0x85d   :  { %449 = vmatpush.msrb.mxu0 %v144_v58  ;;  %762 = vmatpush.msrb.mxu1 %v144_v58 }
 0x85e   :  { %1069 = vmatpush.msrb.mxu2 %v144_v58 }
 0x85f   :  { %450 = vmatpush.msrb.mxu0 %v143_v44  ;;  %763 = vmatpush.msrb.mxu1 %v143_v44 }
 0x860   :  { %1070 = vmatpush.msrb.mxu2 %v143_v44 }
 0x861   :  { %451 = vmatpush.msrb.mxu0 %v142_v45  ;;  %764 = vmatpush.msrb.mxu1 %v142_v45 }
 0x862   :  { %1071 = vmatpush.msrb.mxu2 %v142_v45 }
 0x863   :  { %452 = vmatpush.msrb.mxu0 %v141_v46  ;;  %765 = vmatpush.msrb.mxu1 %v141_v46 }
 0x864   :  { %1072 = vmatpush.msrb.mxu2 %v141_v46 }
 0x865   :  { %927 = vmatpush.msra.mxu0 %v2016_v60  ;;  %1352 = vmatpush.msra.mxu1 %v148_v38 }
 0x867   :  { %928 = vmatpush.msra.mxu0 %v2019_v61  ;;  %1353 = vmatpush.msra.mxu1 %v147_v40 }
 0x869   :  { %929 = vmatpush.msra.mxu0 %v2021_v62  ;;  %1354 = vmatpush.msra.mxu1 %v146_v41 }
 0x86b   :  { %930 = vmatpush.msra.mxu0 %v2024_v63  ;;  %1355 = vmatpush.msra.mxu1 %v145_v42 }
 0x86d   :  { %1356 = vmatpush.msra.mxu1 %v144_v58 }
 0x86f   :  { %1357 = vmatpush.msra.mxu1 %v143_v44 }
 0x871   :  { %1358 = vmatpush.msra.mxu1 %v142_v45 }
 0x873   :  { %1359 = vmatpush.msra.mxu1 %v141_v46 }
 0x897   :  { %v2117_v37 = vpop.permute.xlu0 %407 }
 0x898   :  { %v415_v49 = vmul.f32 %v2117_v37, %v2121_v47  ;;  %v504_v1 = vperm.slane %v2117_v37, %v2134_v56 }
 0x89a   :  { %v418_v50 = vsel %vm417_vm15, %v415_v49, 0.0 }
 0x89b   :  { %v419_v54 = vrot.slane %v418_v50, 4 }
 0x89d   :  { %v420_v57 = vadd.f32 %v419_v54, %v418_v50 }
 0x89f   :  { %v2119_v17 = vpop.permute.xlu0 %911  ;;  %v421_v4 = vrot.slane %v420_v57, 2 }
 0x8a1   :  { %v422_v8 = vadd.f32 %v421_v4, %v420_v57 }
 0x8a3   :  { %v423_v14 = vrot.slane %v422_v8, 1 }
 0x8a5   :  { %v424_v20 = vadd.f32 %v423_v14, %v422_v8 }
 0x8b7   :  { %v1199_v48 = vpop.permute.xlu0 %1198 }
 0x8b8   :  { %1423 = vst.msk [vmem:[#allocation14] sm:$0x3] %vm1420_vm12, %v1199_v48 }
 0x8be   :  { %v1169_v52 = vpop.permute.xlu1 %1168 }
 0x8bf   :  { %v1171_v53 = vmul.f32 %v1169_v52, %v2104_v51 }
 0x8c1   :  { %1173 = vrot.lane.b32.xlu1 %v1171_v53, %s1839_s5 }
 0x8c6   :  { %v413_v0 = vpop.permute.xlu1 %412 }
 0x8c7   :  { %v416_v2 = vmul.f32 %v413_v0, %v2136_v59  ;;  %v505_v51 = vperm.slane %v413_v0, %v2134_v56 }
 0x8c9   :  { %v425_v5 = vsel %vm417_vm15, %v416_v2, 0.0  ;;  %v2144_v6 = vsel %vm318_vm13, %v505_v51, %v504_v1 }
 0x8ca   :  { %v426_v7 = vrot.slane %v425_v5, 4 }
 0x8cc   :  { %v427_v9 = vadd.f32 %v426_v7, %v425_v5 }
 0x8ce   :  { %v428_v10 = vrot.slane %v427_v9, 2  ;;  %v605_v11 = vpop.permute.xlu1 %604 }
 0x8cf   :  { %1487 = vmatmul.msk.f32.vlgmr.msra.gmra.mxu3 %vm152_vm0, %v605_v11 }
 0x8d0   :  { %v429_v15 = vadd.f32 %v428_v10, %v427_v9  ;;  %1189 = vmatpush.msra.mxu3 %v1983_v30 }
 0x8d2   :  { %v430_v19 = vrot.slane %v429_v15, 1  ;;  %1190 = vmatpush.msra.mxu3 %v1985_v31 }
 0x8d4   :  { %v431_v21 = vadd.f32 %v430_v19, %v429_v15  ;;  %1191 = vmatpush.msra.mxu3 %v1988_v32 }
 0x8d6   :  { %v434_v22 = vsel %vm318_vm13, %v431_v21, %v424_v20  ;;  %1192 = vmatpush.msra.mxu3 %v1991_v33 }
 0x8d7   :  { %1481 = vmatmul.msk.f32.vlgmr.msrb.gmra.mxu0 %vm417_vm15, %v434_v22  ;;  %1494 = vmatmul.msk.f32.vlgmr.msrb.gmra.mxu3 %vm152_vm0, %v2081_v3 }
 0x8d8   :  { %1214 = vmatpush.msrb.mxu0 %v2016_v60 }
 0x8da   :  { %1215 = vmatpush.msrb.mxu0 %v2019_v61 }
 0x8dc   :  { %1216 = vmatpush.msrb.mxu0 %v2021_v62 }
 0x8de   :  { %1217 = vmatpush.msrb.mxu0 %v2024_v63 }
 0x8df   :  { %1495 = vmatmul.msk.f32.vlgmr.msra.gmra.mxu0 %vm152_vm0, %v2119_v17 }
 0x8e7   :  { %1502 = vmatmul.msk.f32.vlgmr.msrb.gmra.mxu0 %vm152_vm0, %v1199_v48 }
 0x933   :  { %v1174_v30 = vpop.permute.xlu1 %1173 }
 0x934   :  { %1421 = vst.msk [vmem:[#allocation12] sm:$0x3] %vm1420_vm12, %v1174_v30  ;;  %1501 = vmatmul.msk.f32.vlgmr.msra.gmra.mxu3 %vm152_vm0, %v1174_v30 }
 0x952   :  { %v2164_v31 = vpop.f32.mrf.mxu3 }
 0x953   :  { %v628_v32 = vadd.f32 %v2164_v31, %v2094_v18 }
 0x954   :  { %v2168_v33 = vpop.f32.mrf.mxu0 }
 0x955   :  { %v630_v60 = vrot.slane %v628_v32, 1  ;;  %v631_v61 = vperm.slane %v628_v32, 0 }
 0x957   :  { %v632_v62 = vperm.slane %v630_v60, 0  ;;  %v635_v63 = vadd.f32 %v631_v61, %v2051_v27 }
 0x959   :  { %v636_v3 = vadd.f32 %v632_v62, %v2066_v43  ;;  %1575 = vtanh.f32 %v635_v63 }
 0x95a   :  { %v2172_v25 = vpop.f32.mrf.mxu3 }
 0x95b   :  { %1577 = vtanh.f32 %v636_v3 }
 0x95c   :  { %v2174_v16 = vpop.f32.mrf.mxu0 }
 0x95d   :  { %v935_v26 = vadd.f32 %v2174_v16, %v2172_v25 }
 0x95f   :  { %v1576_v28 = vpop.eup %1575  ;;  %v937_v34 = vrot.slane %v935_v26, 1  ;;  %v938_v35 = vperm.slane %v935_v26, 0 }
 0x960   :  { %v639_v36 = vmul.f32 %v1576_v28, %v2057_v29 }
 0x961   :  { %v1578_v39 = vpop.eup %1577  ;;  %v939_v37 = vperm.slane %v937_v34, 0  ;;  %v942_v38 = vadd.f32 %v938_v35, %v2051_v27 }
 0x962   :  { %v641_v40 = vsel %vm152_vm0, %v639_v36, 0.0  ;;  %v640_v41 = vmul.f32 %v1578_v39, %v2057_v29 }
 0x963   :  { %v943_v42 = vadd.f32 %v939_v37, %v2066_v43  ;;  %1579 = vtanh.f32 %v942_v38  ;;  %642 = vadd.xlane.f32.xlu1 %v641_v40 }
 0x964   :  { %v644_v17 = vsel %vm152_vm0, %v640_v41, 0.0  ;;  %v2188_v50 = vpop.f32.mrf.mxu0 }
 0x965   :  { %645 = vadd.xlane.f32.xlu0 %v644_v17  ;;  %1581 = vtanh.f32 %v943_v42 }
 0x969   :  { %v1580_v58 = vpop.eup %1579 }
 0x96a   :  { %v946_v44 = vmul.f32 %v1580_v58, %v2057_v29 }
 0x96b   :  { %v1582_v46 = vpop.eup %1581 }
 0x96c   :  { %v948_v45 = vsel %vm152_vm0, %v946_v44, 0.0  ;;  %v947_v48 = vmul.f32 %v1582_v46, %v2057_v29 }
 0x96d   :  { %949 = vadd.xlane.f32.xlu2 %v948_v45 }
 0x96e   :  { %v951_v49 = vsel %vm152_vm0, %v947_v48, 0.0 }
 0x975   :  { %952 = vadd.xlane.f32.xlu2 %v951_v49 }
 0x9b7   :  { %v2190_v52 = vpop.f32.mrf.mxu3 }
 0x9b8   :  { %v1222_v53 = vadd.f32 %v2188_v50, %v2190_v52 }
 0x9ba   :  { %v1224_v54 = vrot.slane %v1222_v53, 1  ;;  %v1225_v57 = vperm.slane %v1222_v53, 0 }
 0x9bc   :  { %v1226_v0 = vperm.slane %v1224_v54, 0  ;;  %v1229_v1 = vadd.f32 %v1225_v57, %v2051_v27 }
 0x9be   :  { %v1230_v2 = vadd.f32 %v1226_v0, %v2066_v43  ;;  %1583 = vtanh.f32 %v1229_v1 }
 0x9c0   :  { %1585 = vtanh.f32 %v1230_v2 }
 0x9c4   :  { %v1584_v51 = vpop.eup %1583 }
 0x9c5   :  { %v1233_v4 = vmul.f32 %v1584_v51, %v2057_v29 }
 0x9c6   :  { %v1586_v7 = vpop.eup %1585 }
 0x9c7   :  { %v1235_v5 = vsel %vm152_vm0, %v1233_v4, 0.0  ;;  %v1234_v8 = vmul.f32 %v1586_v7, %v2057_v29 }
 0x9c8   :  { %1236 = vadd.xlane.f32.xlu2 %v1235_v5 }
 0x9c9   :  { %v1238_v9 = vsel %vm152_vm0, %v1234_v8, 0.0 }
 0x9d0   :  { %1239 = vadd.xlane.f32.xlu2 %v1238_v9 }
 0x9d6   :  { %v643_v10 = vpop.xlane.xlu1 %642 }
 0x9d7   :  { %v649_v27 = vperm.slane %v643_v10, %v2075_v55 }
 0x9d8   :  { %v646_v11 = vpop.xlane.xlu0 %645 }
 0x9d9   :  { %v650_v43 = vperm.slane %v646_v11, %v2075_v55 }
 0x9db   :  { %v651_v14 = vsel %vm318_vm13, %v650_v43, %v649_v27 }
 0x9dc   :  { %v653_v15 = vsel %vm321_vm14, %v651_v14, -inf }
 0x9dd   :  { %654 = vmax.xlane.f32.xlu2 %v653_v15 }
 0x9e0   :  { %v950_v19 = vpop.xlane.xlu2 %949 }
 0x9e1   :  { %v956_v21 = vperm.slane %v950_v19, %v2075_v55 }
 0x9e8   :  { %v953_v20 = vpop.xlane.xlu2 %952 }
 0x9e9   :  { %v957_v29 = vperm.slane %v953_v20, %v2075_v55 }
 0x9eb   :  { %v958_v22 = vsel %vm318_vm13, %v957_v29, %v956_v21 }
 0x9ec   :  { %v960_v30 = vsel %vm321_vm14, %v958_v22, -inf }
 0x9ed   :  { %961 = vmax.xlane.f32.xlu1 %v960_v30 }
 0xa3b   :  { %v1237_v32 = vpop.xlane.xlu2 %1236 }
 0xa3c   :  { %v1243_v61 = vperm.slane %v1237_v32, %v2075_v55 }
 0xa43   :  { %v1240_v60 = vpop.xlane.xlu2 %1239 }
 0xa44   :  { %v1244_v62 = vperm.slane %v1240_v60, %v2075_v55 }
 0xa46   :  { %v1245_v63 = vsel %vm318_vm13, %v1244_v62, %v1243_v61 }
 0xa47   :  { %v1247_v3 = vsel %vm321_vm14, %v1245_v63, -inf }
 0xa48   :  { %1248 = vmax.xlane.f32.xlu2 %v1247_v3 }
 0xa50   :  { %v655_v26 = vpop.xlane.xlu2 %654 }
 0xa51   :  { %v657_v28 = vperm.slane %v655_v26, 0  ;;  %v658_v34 = vperm.slane %v655_v26, 1 }
 0xa53   :  { %v661_v35 = vsub.f32 %v643_v10, %v657_v28  ;;  %v662_v36 = vsub.f32 %v646_v11, %v658_v34 }
 0xa55   :  { %v663_v39 = vmul.f32 1.442695, %v661_v35  ;;  %v665_v37 = vmul.f32 1.442695, %v662_v36 }
 0xa57   :  { %1587 = vpow2.f32 %v663_v39 }
 0xa58   :  { %1589 = vpow2.f32 %v665_v37 }
 0xa5d   :  { %v1588_v38 = vpop.eup %1587 }
 0xa5e   :  { %v1590_v40 = vpop.eup %1589  ;;  %v2213_v41 = vmul.f32 %v1588_v38, %v2085_v12 }
 0xa5f   :  { %v2216_v42 = vmul.f32 %v1590_v40, %v2087_v13 }
 0xa60   :  { %v962_v17 = vpop.xlane.xlu1 %961  ;;  %672 = vperm.xlu0 %1528, %v2213_v41  }
 0xa61   :  { %v964_v58 = vperm.slane %v962_v17, 0  ;;  %v965_v44 = vperm.slane %v962_v17, 1  ;;  %675 = vperm.xlu1 %1526, %v2216_v42  }
 0xa63   :  { %v968_v45 = vsub.f32 %v950_v19, %v964_v58  ;;  %v969_v46 = vsub.f32 %v953_v20, %v965_v44 }
 0xa65   :  { %v970_v48 = vmul.f32 1.442695, %v968_v45  ;;  %v972_v49 = vmul.f32 1.442695, %v969_v46 }
 0xa67   :  { %1591 = vpow2.f32 %v970_v48 }
 0xa68   :  { %1593 = vpow2.f32 %v972_v49 }
 0xa6d   :  { %v1592_v53 = vpop.eup %1591 }
 0xa6e   :  { %v1594_v54 = vpop.eup %1593  ;;  %v2221_v57 = vmul.f32 %v1592_v53, %v2085_v12 }
 0xa6f   :  { %v2224_v0 = vmul.f32 %v1594_v54, %v2087_v13 }
 0xa70   :  { %979 = vperm.xlu2 %1527, %v2221_v57  }
 0xa71   :  { %982 = vperm.xlu0 %1528, %v2224_v0  }
 0xabb   :  { %v1249_v1 = vpop.xlane.xlu2 %1248 }
 0xabc   :  { %v1251_v2 = vperm.slane %v1249_v1, 0  ;;  %v1252_v51 = vperm.slane %v1249_v1, 1 }
 0xabe   :  { %v1255_v4 = vsub.f32 %v1237_v32, %v1251_v2  ;;  %v1256_v5 = vsub.f32 %v1240_v60, %v1252_v51 }
 0xac0   :  { %v1257_v7 = vmul.f32 1.442695, %v1255_v4  ;;  %v1259_v8 = vmul.f32 1.442695, %v1256_v5 }
 0xac2   :  { %1595 = vpow2.f32 %v1257_v7 }
 0xac3   :  { %1597 = vpow2.f32 %v1259_v8 }
 0xac8   :  { %v1596_v9 = vpop.eup %1595 }
 0xac9   :  { %v1598_v10 = vpop.eup %1597  ;;  %v2229_v11 = vmul.f32 %v1596_v9, %v2085_v12 }
 0xaca   :  { %v2232_v27 = vmul.f32 %v1598_v10, %v2087_v13  ;;  %v980_v29 = vpop.permute.xlu2 %979 }
 0xacb   :  { %1266 = vperm.xlu1 %1526, %v2229_v11   ;;  %v984_v22 = vperm.slane %v980_v29, %v2075_v55 }
 0xacc   :  { %1269 = vperm.xlu0 %1528, %v2232_v27  }
 0xad2   :  { %v673_v43 = vpop.permute.xlu0 %672 }
 0xad3   :  { %v676_v14 = vpop.permute.xlu1 %675  ;;  %v677_v15 = vperm.slane %v673_v43, %v2075_v55 }
 0xad4   :  { %v678_v19 = vperm.slane %v676_v14, %v2075_v55 }
 0xad6   :  { %v679_v20 = vsel %vm318_vm13, %v678_v19, %v677_v15 }
 0xad7   :  { %v681_v21 = vsel %vm321_vm14, %v679_v20, 0.0 }
 0xad8   :  { %682 = vadd.xlane.f32.xlu2 %v681_v21 }
 0xae3   :  { %v983_v12 = vpop.permute.xlu0 %982 }
 0xae4   :  { %v985_v13 = vperm.slane %v983_v12, %v2075_v55 }
 0xae6   :  { %v986_v30 = vsel %vm318_vm13, %v985_v13, %v984_v22 }
 0xae7   :  { %v988_v32 = vsel %vm321_vm14, %v986_v30, 0.0 }
 0xaf5   :  { %989 = vadd.xlane.f32.xlu1 %v988_v32 }
 0xb3d   :  { %v1267_v60 = vpop.permute.xlu1 %1266 }
 0xb3e   :  { %v1270_v61 = vpop.permute.xlu0 %1269  ;;  %v1271_v62 = vperm.slane %v1267_v60, %v2075_v55 }
 0xb3f   :  { %v1272_v63 = vperm.slane %v1270_v61, %v2075_v55 }
 0xb41   :  { %v1273_v3 = vsel %vm318_vm13, %v1272_v63, %v1271_v62 }
 0xb42   :  { %v1275_v26 = vsel %vm321_vm14, %v1273_v3, 0.0 }
 0xb43   :  { %1276 = vadd.xlane.f32.xlu0 %v1275_v26 }
 0xb4b   :  { %v683_v28 = vpop.xlane.xlu2 %682 }
 0xb4c   :  { %v685_v34 = vperm.slane %v683_v28, 0  ;;  %v686_v35 = vperm.slane %v683_v28, 1 }
 0xb4e   :  { %1599 = vrcp.f32 %v685_v34  ;;  %v700_v58 = vand.u32 2147483648, %v685_v34  ;;  %v715_v44 = vand.u32 2147483648, %v686_v35  ;;  %v698_v55 = vand.u32 2147483647, %v685_v34 }
 0xb4f   :  { %1601 = vrcp.f32 %v686_v35  ;;  %v713_v48 = vand.u32 2147483647, %v686_v35  ;;  %vm694_vm14 = vweird.f32 %v685_v34  ;;  %vm709_vm3 = vweird.f32 %v686_v35 }
 0xb50   :  { %v701_v54 = vor.u32 1.1754944e-38, %v700_v58  ;;  %v716_v1 = vor.u32 1.1754944e-38, %v715_v44  ;;  %vm699_vm6 = vcmp.eq.f32.partialorder %v698_v55, 8.507059e+37 }
 0xb51   :  { %vm714_vm7 = vcmp.eq.f32.partialorder %v713_v48, 8.507059e+37 }
 0xb54   :  { %v1600_v36 = vpop.eup %1599 }
 0xb55   :  { %v1602_v39 = vpop.eup %1601  ;;  %v690_v37 = vmul.f32 %v1600_v36, %v685_v34  ;;  %vm695_vm1 = vweird.f32 %v1600_v36 }
 0xb56   :  { %v705_v38 = vmul.f32 %v1602_v39, %v686_v35  ;;  %vm710_vm2 = vweird.f32 %v1602_v39  ;;  %vm696_vm4 = vmor %vm694_vm14, %vm695_vm1 }
 0xb57   :  { %v691_v40 = vsub.f32 1.0, %v690_v37  ;;  %vm711_vm5 = vmor %vm709_vm3, %vm710_vm2 }
 0xb58   :  { %v706_v17 = vsub.f32 1.0, %v705_v38 }
 0xb59   :  { %v692_v45 = vmul.f32 %v1600_v36, %v691_v40 }
 0xb5a   :  { %v707_v46 = vmul.f32 %v1602_v39, %v706_v17 }
 0xb5b   :  { %v693_v49 = vadd.f32 %v1600_v36, %v692_v45 }
 0xb5c   :  { %v708_v53 = vadd.f32 %v1602_v39, %v707_v46 }
 0xb5d   :  { %v697_v2 = vsel %vm696_vm4, %v1600_v36, %v693_v49 }
 0xb5e   :  { %v712_v51 = vsel %vm711_vm5, %v1602_v39, %v708_v53  ;;  %v702_v4 = vsel %vm699_vm6, %v701_v54, %v697_v2 }
 0xb5f   :  { %v717_v5 = vsel %vm714_vm7, %v716_v1, %v712_v51  ;;  %v703_v7 = vmul.f32 %v702_v4, %v2213_v41  ;;  %v474_v51 = vld [vmem:[%s2383_s1] sm:$0x3] }
 0xb60   :  { %v718_v8 = vmul.f32 %v717_v5, %v2216_v42 }
 0xb61   :  { %721 = vperm.xlu2 %1527, %v703_v7  }
 0xb62   :  { %726 = vperm.xlu1 %1526, %v718_v8  }
 0xb68   :  { %v990_v9 = vpop.xlane.xlu1 %989 }
 0xb69   :  { %v992_v10 = vperm.slane %v990_v9, 0  ;;  %v993_v43 = vperm.slane %v990_v9, 1 }
 0xb6b   :  { %1603 = vrcp.f32 %v992_v10  ;;  %v1007_v29 = vand.u32 2147483648, %v992_v10  ;;  %v1005_v22 = vand.u32 2147483647, %v992_v10  ;;  %v1022_v41 = vand.u32 2147483648, %v993_v43 }
 0xb6c   :  { %1605 = vrcp.f32 %v993_v43  ;;  %v1020_v42 = vand.u32 2147483647, %v993_v43  ;;  %vm1001_vm10 = vweird.f32 %v992_v10  ;;  %vm1016_vm12 = vweird.f32 %v993_v43 }
 0xb6d   :  { %v1008_v60 = vor.u32 1.1754944e-38, %v1007_v29  ;;  %vm1006_vm1 = vcmp.eq.f32.partialorder %v1005_v22, 8.507059e+37  ;;  %v1023_v63 = vor.u32 1.1754944e-38, %v1022_v41 }
 0xb6e   :  { %vm1021_vm14 = vcmp.eq.f32.partialorder %v1020_v42, 8.507059e+37 }
 0xb71   :  { %v1604_v14 = vpop.eup %1603 }
 0xb72   :  { %v1606_v15 = vpop.eup %1605  ;;  %v997_v19 = vmul.f32 %v1604_v14, %v992_v10  ;;  %vm1002_vm8 = vweird.f32 %v1604_v14 }
 0xb73   :  { %v1012_v20 = vmul.f32 %v1606_v15, %v993_v43  ;;  %vm1017_vm9 = vweird.f32 %v1606_v15  ;;  %vm1003_vm11 = vmor %vm1001_vm10, %vm1002_vm8 }
 0xb74   :  { %v998_v21 = vsub.f32 1.0, %v997_v19  ;;  %vm1018_vm2 = vmor %vm1016_vm12, %vm1017_vm9  ;;  %v1530_v19 = vld [vmem:[%s2393_s11] ss:$0 sm:$0xff]  ;;  %s1842_s11 = smov 104  }
 0xb75   :  { %v1013_v12 = vsub.f32 1.0, %v1012_v20 }
 0xb76   :  { %v999_v13 = vmul.f32 %v1604_v14, %v998_v21 }
 0xb77   :  { %v1014_v30 = vmul.f32 %v1606_v15, %v1013_v12 }
 0xb78   :  { %v1000_v32 = vadd.f32 %v1604_v14, %v999_v13 }
 0xb79   :  { %v1015_v61 = vadd.f32 %v1606_v15, %v1014_v30 }
 0xb7a   :  { %v1004_v62 = vsel %vm1003_vm11, %v1604_v14, %v1000_v32 }
 0xb7b   :  { %v1009_v3 = vsel %vm1006_vm1, %v1008_v60, %v1004_v62  ;;  %v1019_v26 = vsel %vm1018_vm2, %v1606_v15, %v1015_v61  ;;  %vm513_vm2 = vcmask 326656  }
 0xb7c   :  { %v1010_v28 = vmul.f32 %v1009_v3, %v2221_v57  ;;  %v1024_v34 = vsel %vm1021_vm14, %v1023_v63, %v1019_v26  ;;  %vm515_vm14 = vcmask 334848  }
 0xb7d   :  { %v1025_v35 = vmul.f32 %v1024_v34, %v2224_v0 }
 0xb7e   :  { %1028 = vperm.xlu0 %1528, %v1010_v28  }
 0xb7f   :  { %1033 = vperm.xlu2 %1527, %v1025_v35  }
 0xb87   :  { %458 = vrot.lane.b32.xlu2 %v2168_v33, %s1839_s5 }
 0xb8f   :  { %476 = vrot.lane.b32.xlu2 %v474_v51, %s1838_s2 }
 0xbb6   :  { %v1277_v36 = vpop.xlane.xlu0 %1276 }
 0xbb7   :  { %v1279_v39 = vperm.slane %v1277_v36, 0  ;;  %v1280_v37 = vperm.slane %v1277_v36, 1 }
 0xbb9   :  { %1607 = vrcp.f32 %v1279_v39  ;;  %v1294_v57 = vand.u32 2147483648, %v1279_v39  ;;  %v1292_v46 = vand.u32 2147483647, %v1279_v39  ;;  %v1309_v48 = vand.u32 2147483648, %v1280_v37 }
 0xbba   :  { %1609 = vrcp.f32 %v1280_v37  ;;  %v1307_v33 = vand.u32 2147483647, %v1280_v37  ;;  %vm1288_vm5 = vweird.f32 %v1279_v39  ;;  %vm1303_vm7 = vweird.f32 %v1280_v37 }
 0xbbb   :  { %v2254_v55 = vpop.permute.xlu2 %721  ;;  %v1295_v1 = vor.u32 1.1754944e-38, %v1294_v57  ;;  %vm1293_vm8 = vcmp.eq.f32.partialorder %v1292_v46, 8.507059e+37  ;;  %v1310_v5 = vor.u32 1.1754944e-38, %v1309_v48 }
 0xbbc   :  { %v729_v54 = vmul.f32 %v2254_v55, %v2121_v47  ;;  %vm1308_vm10 = vcmp.eq.f32.partialorder %v1307_v33, 8.507059e+37 }
 0xbbe   :  { %v731_v43 = vsel %vm417_vm15, %v729_v54, 0.0 }
 0xbbf   :  { %v1608_v38 = vpop.eup %1607  ;;  %v732_v15 = vrot.slane %v731_v43, 4 }
 0xbc0   :  { %v1610_v40 = vpop.eup %1609  ;;  %v1284_v17 = vmul.f32 %v1608_v38, %v1279_v39  ;;  %vm1289_vm3 = vweird.f32 %v1608_v38 }
 0xbc1   :  { %v1299_v58 = vmul.f32 %v1610_v40, %v1280_v37  ;;  %vm1304_vm4 = vweird.f32 %v1610_v40  ;;  %vm1290_vm6 = vmor %vm1288_vm5, %vm1289_vm3  ;;  %v733_v20 = vadd.f32 %v732_v15, %v731_v43 }
 0xbc2   :  { %v1285_v44 = vsub.f32 1.0, %v1284_v17  ;;  %vm1305_vm9 = vmor %vm1303_vm7, %vm1304_vm4 }
 0xbc3   :  { %v1300_v45 = vsub.f32 1.0, %v1299_v58  ;;  %v734_v12 = vrot.slane %v733_v20, 2 }
 0xbc4   :  { %v1286_v0 = vmul.f32 %v1608_v38, %v1285_v44 }
 0xbc5   :  { %v1301_v49 = vmul.f32 %v1610_v40, %v1300_v45  ;;  %v735_v13 = vadd.f32 %v734_v12, %v733_v20 }
 0xbc6   :  { %v1287_v53 = vadd.f32 %v1608_v38, %v1286_v0 }
 0xbc7   :  { %v1302_v2 = vadd.f32 %v1610_v40, %v1301_v49  ;;  %v736_v30 = vrot.slane %v735_v13, 1 }
 0xbc8   :  { %v1291_v4 = vsel %vm1290_vm6, %v1608_v38, %v1287_v53 }
 0xbc9   :  { %v1296_v7 = vsel %vm1293_vm8, %v1295_v1, %v1291_v4  ;;  %v1306_v8 = vsel %vm1305_vm9, %v1610_v40, %v1302_v2  ;;  %v737_v61 = vadd.f32 %v736_v30, %v735_v13 }
 0xbca   :  { %v1297_v9 = vmul.f32 %v1296_v7, %v2229_v11  ;;  %v1311_v10 = vsel %vm1308_vm10, %v1310_v5, %v1306_v8 }
 0xbcb   :  { %v1312_v14 = vmul.f32 %v1311_v10, %v2232_v27 }
 0xbcc   :  { %1315 = vperm.xlu0 %1528, %v1297_v9  }
 0xbcd   :  { %1320 = vperm.xlu1 %1526, %v1312_v14  }
 0xbd4   :  { %v2268_v21 = vpop.permute.xlu1 %726  ;;  %464 = vrot.lane.b32.xlu0 %v1530_v19, %s1839_s5 }
 0xbd5   :  { %v730_v11 = vmul.f32 %v2268_v21, %v2136_v59  ;;  %469 = vrot.lane.b32.xlu1 %v2045_v23, %s1839_s5 }
 0xbd7   :  { %v738_v27 = vsel %vm417_vm15, %v730_v11, 0.0 }
 0xbd8   :  { %v739_v29 = vrot.slane %v738_v27, 4 }
 0xbd9   :  { %v2276_v60 = vpop.permute.xlu2 %1033 }
 0xbda   :  { %v740_v22 = vadd.f32 %v739_v29, %v738_v27  ;;  %v1037_v63 = vmul.f32 %v2276_v60, %v2136_v59 }
 0xbdc   :  { %v741_v41 = vrot.slane %v740_v22, 2  ;;  %v1045_v23 = vsel %vm417_vm15, %v1037_v63, 0.0 }
 0xbdd   :  { %v1046_v26 = vrot.slane %v1045_v23, 4 }
 0xbde   :  { %v742_v42 = vadd.f32 %v741_v41, %v740_v22 }
 0xbdf   :  { %v1047_v28 = vadd.f32 %v1046_v26, %v1045_v23 }
 0xbe0   :  { %v743_v32 = vrot.slane %v742_v42, 1 }
 0xbe1   :  { %v1048_v36 = vrot.slane %v1047_v28, 2  ;;  %v459_v2 = vpop.permute.xlu2 %458 }
 0xbe2   :  { %v744_v62 = vadd.f32 %v743_v32, %v742_v42 }
 0xbe3   :  { %v1049_v38 = vadd.f32 %v1048_v36, %v1047_v28 }
 0xbe4   :  { %v747_v3 = vsel %vm318_vm13, %v744_v62, %v737_v61 }
 0xbe5   :  { %1488 = vmatmul.msk.f32.vlgmr.msrb.gmra.mxu1 %vm417_vm15, %v747_v3  ;;  %v1050_v58 = vrot.slane %v1049_v38, 1 }
 0xbe7   :  { %v1051_v57 = vadd.f32 %v1050_v58, %v1049_v38 }
 0xbe9   :  { %v477_v27 = vpop.permute.xlu2 %476 }
 0xbf0   :  { %v2283_v34 = vpop.permute.xlu0 %1028 }
 0xbf1   :  { %v1036_v35 = vmul.f32 %v2283_v34, %v2121_v47 }
 0xbf3   :  { %v1038_v39 = vsel %vm417_vm15, %v1036_v35, 0.0 }
 0xbf4   :  { %v1039_v37 = vrot.slane %v1038_v39, 4 }
 0xbf6   :  { %v1040_v40 = vadd.f32 %v1039_v37, %v1038_v39 }
 0xbf8   :  { %v1041_v17 = vrot.slane %v1040_v40, 2 }
 0xbfa   :  { %v1042_v44 = vadd.f32 %v1041_v17, %v1040_v40  ;;  %v1497_v40 = vld [vmem:[%s2383_s1 + $0x4] sm:$0x3] }
 0xbfc   :  { %v1043_v45 = vrot.slane %v1042_v44, 1 }
 0xbfe   :  { %v1044_v0 = vadd.f32 %v1043_v45, %v1042_v44 }
 0xc00   :  { %v1054_v46 = vsel %vm318_vm13, %v1051_v57, %v1044_v0 }
 0xc01   :  { %1496 = vmatmul.msk.f32.vlgmr.msrb.gmra.mxu2 %vm417_vm15, %v1054_v46 }
 0xc3e   :  { %v1316_v48 = vpop.permute.xlu0 %1315 }
 0xc3f   :  { %v1323_v49 = vmul.f32 %v1316_v48, %v2121_v47  ;;  %v1406_v33 = vperm.slane %v1316_v48, %v2134_v56  ;;  %v1321_v53 = vpop.permute.xlu1 %1320  ;;  %v461_v47 = vadd.f32 %v459_v2, %v2047_v24 }
 0xc40   :  { %v1324_v54 = vmul.f32 %v1321_v53, %v2136_v59  ;;  %v1407_v1 = vperm.slane %v1321_v53, %v2134_v56 }
 0xc41   :  { %v1325_v51 = vsel %vm417_vm15, %v1323_v49, 0.0 }
 0xc42   :  { %v1326_v4 = vrot.slane %v1325_v51, 4  ;;  %v1332_v5 = vsel %vm417_vm15, %v1324_v54, 0.0  ;;  %v2297_v7 = vsel %vm318_vm13, %v1407_v1, %v1406_v33 }
 0xc43   :  { %v1333_v8 = vrot.slane %v1332_v5, 4 }
 0xc44   :  { %v1327_v9 = vadd.f32 %v1326_v4, %v1325_v51 }
 0xc45   :  { %v1334_v10 = vadd.f32 %v1333_v8, %v1332_v5 }
 0xc46   :  { %v1328_v43 = vrot.slane %v1327_v9, 2  ;;  %v2300_v14 = vpop.permute.xlu0 %464 }
 0xc47   :  { %v1335_v59 = vrot.slane %v1334_v10, 2  ;;  %v470_v15 = vpop.permute.xlu1 %469  ;;  %v467_v19 = vadd.f32 %v2300_v14, %v461_v47 }
 0xc48   :  { %v1329_v20 = vadd.f32 %v1328_v43, %v1327_v9  ;;  %v472_v11 = vadd.f32 %v470_v15, %v2047_v24 }
 0xc49   :  { %v1336_v12 = vadd.f32 %v1335_v59, %v1334_v10  ;;  %500 = vrot.lane.b32.xlu0 %v467_v19, %s1840_s27 }
 0xc4a   :  { %v1330_v29 = vrot.slane %v1329_v20, 1  ;;  %v473_v13 = vadd.f32 %v472_v11, %v459_v2  ;;  %v813_v11 = vperm.slane %v2268_v21, %v2134_v56 }
 0xc4b   :  { %v1337_v22 = vrot.slane %v1336_v12, 1 }
 0xc4c   :  { %v1331_v41 = vadd.f32 %v1330_v29, %v1329_v20  ;;  %v479_v30 = vadd.f32 %v477_v27, %v473_v13 }
 0xc4d   :  { %v1338_v42 = vadd.f32 %v1337_v22, %v1336_v12  ;;  %v812_v12 = vperm.slane %v2254_v55, %v2134_v56 }
 0xc4e   :  { %v1482_v32 = vmul.f32 -1.442695, %v479_v30 }
 0xc4f   :  { %v1341_v61 = vsel %vm318_vm13, %v1338_v42, %v1331_v41  ;;  %v814_v29 = vsel %vm318_vm13, %v813_v11, %v812_v12 }
 0xc50   :  { %1611 = vpow2.f32 %v1482_v32  ;;  %1503 = vmatmul.msk.f32.vlgmr.msra.gmra.mxu1 %vm417_vm15, %v1341_v61 }
 0xc51   :  { %777 = vrot.lane.b32.xlu0 %v2164_v31, %s1839_s5 }
 0xc56   :  { %v1612_v24 = vpop.eup %1611 }
 0xc57   :  { %v483_v62 = vadd.f32 1.0, %v1612_v24 }
 0xc59   :  { %1613 = vrcp.f32 %v483_v62  ;;  %1084 = vrot.lane.b32.xlu0 %v2174_v16, %s1839_s5  ;;  %v495_v28 = vand.u32 2147483648, %v483_v62  ;;  %v493_v36 = vand.u32 2147483647, %v483_v62  ;;  %vm489_vm15 = vweird.f32 %v483_v62  ;;  %v1489_v16 = vld [vmem:[%s2383_s1 + $0x2] sm:$0x3] }
 0xc5b   :  { %v496_v31 = vor.u32 1.1754944e-38, %v495_v28  ;;  %vm494_vm1 = vcmp.eq.f32.partialorder %v493_v36, 8.507059e+37 }
 0xc5f   :  { %v1614_v63 = vpop.eup %1613 }
 0xc60   :  { %v485_v3 = vmul.f32 %v1614_v63, %v483_v62  ;;  %vm490_vm11 = vweird.f32 %v1614_v63 }
 0xc61   :  { %vm491_vm12 = vmor %vm489_vm15, %vm490_vm11 }
 0xc62   :  { %v767_v23 = vpop.f32.mrf.mxu1  ;;  %v486_v26 = vsub.f32 1.0, %v485_v3 }
 0xc63   :  { %771 = vrot.lane.b32.xlu2 %v767_v23, %s1839_s5 }
 0xc64   :  { %v487_v35 = vmul.f32 %v1614_v63, %v486_v26 }
 0xc66   :  { %v488_v39 = vadd.f32 %v1614_v63, %v487_v35 }
 0xc68   :  { %v492_v37 = vsel %vm491_vm12, %v1614_v63, %v488_v39 }
 0xc69   :  { %v497_v38 = vsel %vm494_vm1, %v496_v31, %v492_v37 }
 0xc6a   :  { %509 = vrot.lane.b32.xlu1 %v497_v38, %s1842_s11 }
 0xc72   :  { %785 = vrot.lane.b32.xlu1 %v1489_v16, %s1838_s2 }
 0xc7a   :  { %1371 = vrot.lane.b32.xlu1 %v2188_v50, %s1839_s5  ;;  %v1504_v50 = vld [vmem:[%s2383_s1 + $0x6] sm:$0x3]  ;;  %s1843_s1 = smov [#allocation12]  }
 0xc7b   :  { %s1442_s24 = sshll.u32 %s1843_s1, 4  ;;  %s1443_s24 = int_to_ptr.vmem [resolvable:$true] %s1442_s24 }
 0xc7c   :  { %1447 = dma.vmem_to_hbm [thread:$0]  %s1443_s24, 32, %s1445_s26, [#allocation13]  }
 0xc82   :  { %1092 = vrot.lane.b32.xlu1 %v1497_v40, %s1838_s2 }
 0xc84   :  { %v1074_v45 = vpop.f32.mrf.mxu2 }
 0xcbb   :  { %v501_v0 = vpop.permute.xlu0 %500 }
 0xcbc   :  { %v512_v46 = vsel %vm152_vm0, %v501_v0, %v2144_v6 }
 0xcbd   :  { %v772_v17 = vpop.permute.xlu2 %771 }
 0xcbe   :  { %v774_v58 = vadd.f32 %v772_v17, %v2094_v18 }
 0xcc0   :  { %v775_v44 = vadd.f32 %v774_v58, %v2300_v14 }
 0xcc2   :  { %809 = vrot.lane.b32.xlu2 %v775_v44, %s1840_s27 }
 0xcc3   :  { %v778_v48 = vpop.permute.xlu0 %777 }
 0xcc4   :  { %v780_v54 = vadd.f32 %v778_v48, %v2094_v18 }
 0xcc6   :  { %v781_v1 = vadd.f32 %v780_v54, %v772_v17 }
 0xcca   :  { %1078 = vrot.lane.b32.xlu2 %v1074_v45, %s1839_s5 }
 0xccb   :  { %v1085_v41 = vpop.permute.xlu0 %1084 }
 0xccc   :  { %v1087_v30 = vadd.f32 %v1085_v41, %v2172_v25 }
 0xccd   :  { %v1361_v57 = vpop.f32.mrf.mxu1 }
 0xcce   :  { %1365 = vrot.lane.b32.xlu0 %v1361_v57, %s1839_s5 }
 0xcd2   :  { %1379 = vrot.lane.b32.xlu2 %v1504_v50, %s1838_s2 }
 0xcdc   :  { %v510_v49 = vpop.permute.xlu1 %509 }
 0xcdd   :  { %v514_v33 = vsel %vm513_vm2, %v512_v46, %v510_v49 }
 0xcde   :  { %v516_v53 = vsel %vm515_vm14, %v514_v33, 0.0 }
 0xcdf   :  { %517 = vst [vmem:[#allocation11] sm:$0x3] %v516_v53 }
 0xce4   :  { %v786_v2 = vpop.permute.xlu1 %785 }
 0xce5   :  { %v788_v51 = vadd.f32 %v786_v2, %v781_v1 }
 0xce7   :  { %v1490_v4 = vmul.f32 -1.442695, %v788_v51 }
 0xce9   :  { %1615 = vpow2.f32 %v1490_v4 }
 0xcec   :  { %v1372_v27 = vpop.permute.xlu1 %1371 }
 0xced   :  { %v1374_v36 = vadd.f32 %v1372_v27, %v2190_v52 }
 0xcef   :  { %v1616_v5 = vpop.eup %1615 }
 0xcf0   :  { %v792_v8 = vadd.f32 1.0, %v1616_v5 }
 0xcf2   :  { %1617 = vrcp.f32 %v792_v8  ;;  %v804_v10 = vand.u32 2147483648, %v792_v8  ;;  %v802_v59 = vand.u32 2147483647, %v792_v8  ;;  %vm798_vm4 = vweird.f32 %v792_v8 }
 0xcf4   :  { %v805_v18 = vor.u32 1.1754944e-38, %v804_v10  ;;  %vm803_vm6 = vcmp.eq.f32.partialorder %v802_v59, 8.507059e+37  ;;  %v1093_v32 = vpop.permute.xlu1 %1092 }
 0xcf8   :  { %v1618_v9 = vpop.eup %1617 }
 0xcf9   :  { %v794_v47 = vmul.f32 %v1618_v9, %v792_v8  ;;  %vm799_vm3 = vweird.f32 %v1618_v9 }
 0xcfa   :  { %vm800_vm5 = vmor %vm798_vm4, %vm799_vm3 }
 0xcfb   :  { %v795_v6 = vsub.f32 1.0, %v794_v47  ;;  %v1120_v47 = vperm.slane %v2276_v60, %v2134_v56 }
 0xcfd   :  { %v796_v43 = vmul.f32 %v1618_v9, %v795_v6 }
 0xcff   :  { %v797_v15 = vadd.f32 %v1618_v9, %v796_v43 }
 0xd01   :  { %v801_v19 = vsel %vm800_vm5, %v1618_v9, %v797_v15  ;;  %v1119_v9 = vperm.slane %v2283_v34, %v2134_v56 }
 0xd02   :  { %v806_v20 = vsel %vm803_vm6, %v805_v18, %v801_v19 }
 0xd03   :  { %817 = vrot.lane.b32.xlu0 %v806_v20, %s1842_s11  ;;  %v1121_v10 = vsel %vm318_vm13, %v1120_v47, %v1119_v9 }
 0xd1c   :  { %v810_v13 = vpop.permute.xlu2 %809 }
 0xd1d   :  { %v2344_v22 = vsel %vm152_vm0, %v810_v13, %v814_v29 }
 0xd24   :  { %v1079_v42 = vpop.permute.xlu2 %1078 }
 0xd25   :  { %v1081_v61 = vadd.f32 %v1079_v42, %v2172_v25  ;;  %v1088_v24 = vadd.f32 %v1087_v30, %v1079_v42 }
 0xd27   :  { %v1082_v21 = vadd.f32 %v1081_v61, %v2300_v14  ;;  %v1095_v62 = vadd.f32 %v1093_v32, %v1088_v24 }
 0xd29   :  { %v1498_v63 = vmul.f32 -1.442695, %v1095_v62  ;;  %1116 = vrot.lane.b32.xlu1 %v1082_v21, %s1840_s27 }
 0xd2b   :  { %1619 = vpow2.f32 %v1498_v63 }
 0xd2c   :  { %v1380_v37 = vpop.permute.xlu2 %1379 }
 0xd31   :  { %v1620_v55 = vpop.eup %1619 }
 0xd32   :  { %v1099_v3 = vadd.f32 1.0, %v1620_v55 }
 0xd34   :  { %1621 = vrcp.f32 %v1099_v3  ;;  %v1111_v35 = vand.u32 2147483648, %v1099_v3  ;;  %v1109_v25 = vand.u32 2147483647, %v1099_v3  ;;  %vm1105_vm8 = vweird.f32 %v1099_v3 }
 0xd36   :  { %v1112_v17 = vor.u32 1.1754944e-38, %v1111_v35  ;;  %vm1110_vm10 = vcmp.eq.f32.partialorder %v1109_v25, 8.507059e+37 }
 0xd3a   :  { %v1622_v23 = vpop.eup %1621 }
 0xd3b   :  { %v1101_v26 = vmul.f32 %v1622_v23, %v1099_v3  ;;  %vm1106_vm7 = vweird.f32 %v1622_v23 }
 0xd3c   :  { %vm1107_vm9 = vmor %vm1105_vm8, %vm1106_vm7 }
 0xd3d   :  { %v1102_v28 = vsub.f32 1.0, %v1101_v26 }
 0xd3f   :  { %v1103_v39 = vmul.f32 %v1622_v23, %v1102_v28 }
 0xd40   :  { %v1366_v31 = vpop.permute.xlu0 %1365 }
 0xd41   :  { %v1368_v38 = vadd.f32 %v1366_v31, %v2190_v52  ;;  %v1375_v16 = vadd.f32 %v1374_v36, %v1366_v31  ;;  %v1104_v40 = vadd.f32 %v1622_v23, %v1103_v39 }
 0xd43   :  { %v1369_v58 = vadd.f32 %v1368_v38, %v2300_v14  ;;  %v1382_v44 = vadd.f32 %v1380_v37, %v1375_v16  ;;  %v1108_v45 = vsel %vm1107_vm9, %v1622_v23, %v1104_v40 }
 0xd44   :  { %v1113_v57 = vsel %vm1110_vm10, %v1112_v17, %v1108_v45 }
 0xd45   :  { %v1505_v50 = vmul.f32 -1.442695, %v1382_v44  ;;  %1124 = vrot.lane.b32.xlu2 %v1113_v57, %s1842_s11  ;;  %1403 = vrot.lane.b32.xlu0 %v1369_v58, %s1840_s27  ;;  %s1455_s27 = sshll.u32 %s2396_s14, 4  ;;  %s1456_s27 = int_to_ptr.hbm [resolvable:$true] %s1455_s27 }
 0xd46   :  { %1458 = dma.vmem_to_hbm [thread:$0]  %s1454_s29, 32, %s1456_s27, [#allocation13]  }
 0xd47   :  { %1623 = vpow2.f32 %v1505_v50 }
 0xd4d   :  { %v1624_v0 = vpop.eup %1623 }
 0xd4e   :  { %v1386_v46 = vadd.f32 1.0, %v1624_v0 }
 0xd50   :  { %1625 = vrcp.f32 %v1386_v46  ;;  %v1398_v49 = vand.u32 2147483648, %v1386_v46  ;;  %v1396_v53 = vand.u32 2147483647, %v1386_v46  ;;  %vm1392_vm15 = vweird.f32 %v1386_v46 }
 0xd52   :  { %v1399_v1 = vor.u32 1.1754944e-38, %v1398_v49  ;;  %vm1397_vm1 = vcmp.eq.f32.partialorder %v1396_v53, 8.507059e+37 }
 0xd56   :  { %v1626_v52 = vpop.eup %1625 }
 0xd57   :  { %v1388_v14 = vmul.f32 %v1626_v52, %v1386_v46  ;;  %vm1393_vm11 = vweird.f32 %v1626_v52 }
 0xd58   :  { %vm1394_vm12 = vmor %vm1392_vm15, %vm1393_vm11 }
 0xd59   :  { %v1389_v48 = vsub.f32 1.0, %v1388_v14 }
 0xd5b   :  { %v1390_v33 = vmul.f32 %v1626_v52, %v1389_v48 }
 0xd5d   :  { %v1391_v54 = vadd.f32 %v1626_v52, %v1390_v33 }
 0xd5f   :  { %v1395_v2 = vsel %vm1394_vm12, %v1626_v52, %v1391_v54 }
 0xd60   :  { %v1400_v51 = vsel %vm1397_vm1, %v1399_v1, %v1395_v2 }
 0xd61   :  { %1411 = vrot.lane.b32.xlu1 %v1400_v51, %s1842_s11 }
 0xd75   :  { %v818_v4 = vpop.permute.xlu0 %817 }
 0xd76   :  { %v821_v5 = vsel %vm513_vm2, %v2344_v22, %v818_v4 }
 0xd77   :  { %v822_v8 = vsel %vm515_vm14, %v821_v5, 0.0 }
 0xd78   :  { %824 = vst [vmem:[#allocation11 + $0x2] sm:$0x3] %v822_v8 }
 0xd9b   :  { %v1117_v6 = vpop.permute.xlu1 %1116 }
 0xd9c   :  { %v1127_v43 = vsel %vm152_vm0, %v1117_v6, %v1121_v10 }
 0xd9f   :  { %v1125_v59 = vpop.permute.xlu2 %1124 }
 0xda0   :  { %v1128_v15 = vsel %vm513_vm2, %v1127_v43, %v1125_v59 }
 0xda1   :  { %v1129_v18 = vsel %vm515_vm14, %v1128_v15, 0.0 }
 0xda2   :  { %1131 = vst [vmem:[#allocation11 + $0x4] sm:$0x3] %v1129_v18 }
 0xdb7   :  { %v1404_v19 = vpop.permute.xlu0 %1403 }
 0xdb8   :  { %v1414_v56 = vsel %vm152_vm0, %v1404_v19, %v2297_v7 }
 0xdd3   :  { %v1412_v60 = vpop.permute.xlu1 %1411 }
 0xdd4   :  { %v1415_v34 = vsel %vm513_vm2, %v1414_v56, %v1412_v60 }
 0xdd5   :  { %v1416_v20 = vsel %vm515_vm14, %v1415_v34, 0.0 }
 0xdd6   :  { %1418 = vst [vmem:[#allocation11 + $0x6] sm:$0x3] %v1416_v20 }
 0xdd7   :  { %1436 = dma.vmem_to_hbm [thread:$0]  %s1429_s10, 128, %s1431_s30, [#allocation4], %s1839_s5, %s1839_s5, %s1846_s4  }
 0xdd8   :  { %1825 = dma.done.wait [#allocation4], 128  }
 0xdd9   :  { %1826 = vsyncadd [#allocation4], 4294967168 }
 0xdda   :  { %1827 = dma.done.wait [#allocation13], 64  }
 0xddb   :  { %1828 = vsyncadd [#allocation13], 4294967232 }
 0xddc   :  { %1471 = vsyncpa [#allocation3], 1 }
 0xddd   :  { %1472 = vsyncpa [#allocation6], 1 }
 0xdde   :  { %1473 = vsyncpa [#allocation9], 1 }
 0xddf   :  { %1474 = vsyncpa [#allocation4], 1 }
 0xde0   :  { %1475 = vsyncpa [#allocation13], 1 }

</bundles_post_ra>
